<compile_context>
chip_gen: v7x
topology: tpu7x:2x2x1
jax: 0.10.0
libtpu: 0.0.40
codegen_flags: <defaults>
</compile_context>

<pallas_src>
import jax
import jax.numpy as jnp
from jax.experimental import pallas as pl
from jax.experimental.pallas import tpu as pltpu


# ----------------------------------------------------------------------------- kernel

def gnn_kernel(a_ref, p_ref, x_ref, w1_ref, wh_ref, shifts_ref, wf2_ref, bf2_ref, o_ref):
    a = a_ref[0]                                       # bf16 [Np, Np]

    def gcn(h_bf16, w, shift):
        # X @ W'  (W' = W * bn_scale; bf16 operands, f32 accumulation)
        hw = jnp.dot(h_bf16, w, preferred_element_type=jnp.float32)
        # A_hat @ (X W')  (dominant matmul)
        agg = jnp.dot(a, hw.astype(jnp.bfloat16), preferred_element_type=jnp.float32)
        agg = agg + shift                              # folded bias + BN shift (f32)
        return jnp.maximum(agg, 0.1 * agg)             # LeakyReLU(0.1); dropout = identity

    h = gcn(x_ref[0], w1_ref[...], shifts_ref[0:1, :])
    h = gcn(h.astype(jnp.bfloat16), wh_ref[0], shifts_ref[1:2, :])
    h = gcn(h.astype(jnp.bfloat16), wh_ref[1], shifts_ref[2:3, :])

    # global_mean_pool as a matmul; P kept f32 so the 1/|graph| weights are exact.
    pooled = jnp.dot(p_ref[0], h, preferred_element_type=jnp.float32)

    z = jnp.dot(pooled.astype(jnp.bfloat16), wh_ref[2],
                preferred_element_type=jnp.float32) + shifts_ref[3:4, :]
    z = jnp.maximum(z, 0.1 * z)
    o_ref[0] = jnp.dot(z.astype(jnp.bfloat16), wf2_ref[...],
                       preferred_element_type=jnp.float32) + bf2_ref[...]


# ----------------------------------------------------------------------------- wrapper

def _round_up(v, m):
    return ((v + m - 1) // m) * m


def _pad2(x, rows, cols):
    return jnp.pad(x, ((0, rows - x.shape[0]), (0, cols - x.shape[1])))


def prepare_params(params):
    """Fold bias + BatchNorm into (W', shift'), pad to lane-dense shapes, cast weights to
    bf16, and pack into few operands.  Call ONCE (outside the jit hot path)."""
    Fin, H = params["w1"].shape
    O = params["wf2"].shape[1]
    Fp, Hp, Op = _round_up(Fin, 128), _round_up(H, 128), _round_up(O, 128)

    def fold(w, b, s, t):                              # (X@W + b)*s + t == X@(W*s) + (b*s + t)
        return w * s, b * s + t

    w1, sh1 = fold(params["w1"], params["b1"], params["s1"], params["t1"])
    w2, sh2 = fold(params["w2"], params["b2"], params["s2"], params["t2"])
    w3, sh3 = fold(params["w3"], params["b3"], params["s3"], params["t3"])
    wf1, sh4 = fold(params["wf1"], params["bf1"], params["s4"], params["t4"])

    bf16 = jnp.bfloat16
    wh = jnp.stack([_pad2(w2, Hp, Hp), _pad2(w3, Hp, Hp), _pad2(wf1, Hp, Hp)]).astype(bf16)
    shifts = jnp.pad(jnp.concatenate(
        [_pad2(sh1, 1, Hp), _pad2(sh2, 1, Hp), _pad2(sh3, 1, Hp), _pad2(sh4, 1, Hp)], axis=0),
        ((0, 4), (0, 0)))                              # [8, Hp] f32 (sublane aligned)
    return {
        "w1": _pad2(w1, Fp, Hp).astype(bf16),          # [Fp, Hp] bf16
        "wh": wh,                                      # [3, Hp, Hp] bf16 (w2, w3, wf1)
        "shifts": shifts,                              # [8, Hp] f32
        "wf2": _pad2(params["wf2"], Hp, Op).astype(bf16),
        "bf2": _pad2(params["bf2"], 1, Op),            # [1, Op] f32
    }


def prepare_batch(a_hat, pool_mat, x):
    """Pad/cast batched graph inputs once (outside the jit hot path).
    a_hat: [B,N,N] f32, pool_mat: [B,G,N] f32, x: [B,N,Fin] f32."""
    B, N, _ = a_hat.shape
    G, Fin = pool_mat.shape[1], x.shape[2]
    Np, Gp, Fp = _round_up(N, 128), _round_up(G, 8), _round_up(Fin, 128)
    a = jnp.pad(a_hat, ((0, 0), (0, Np - N), (0, Np - N))).astype(jnp.bfloat16)
    p = jnp.pad(pool_mat, ((0, 0), (0, Gp - G), (0, Np - N)))       # keep f32 (exact means)
    xb = jnp.pad(x, ((0, 0), (0, Np - N), (0, Fp - Fin))).astype(jnp.bfloat16)
    return a, p, xb


def gnn_forward(a, p, x, kparams):
    """Fused GNN forward over B independent graph-batches; one grid step per batch."""
    B, Np, _ = a.shape
    Gp = p.shape[1]
    Fp = x.shape[2]
    Hp = kparams["w1"].shape[1]
    Op = kparams["wf2"].shape[1]

    args = (a, p, x, kparams["w1"], kparams["wh"], kparams["shifts"],
            kparams["wf2"], kparams["bf2"])

    per_batch_flops = 2 * (Np * Fp * Hp + 3 * Np * Np * Hp + 2 * Np * Hp * Hp
                           + Gp * Np * Hp + Gp * Hp * Hp + Gp * Hp * Op)
    bytes_accessed = sum(int(t.size) * t.dtype.itemsize for t in args) + B * Gp * Op * 4
    cost = pl.CostEstimate(flops=B * per_batch_flops, transcendentals=0,
                           bytes_accessed=bytes_accessed)

    # Right-sized VMEM budget: per-step block footprint (double-buffered batch inputs +
    # resident weights + intermediates) with generous headroom -- still tiny (< 4 MiB).
    blk_bytes = (Np * Np * 2 + Gp * Np * 4 + Np * Fp * 2            # per-batch blocks
                 + Fp * Hp * 2 + 3 * Hp * Hp * 2 + 8 * Hp * 4       # shared weights
                 + Hp * Op * 2 + Op * 4 + Gp * Op * 4)              # head weights + out
    vmem_limit = max(4 * 1024 * 1024, 8 * blk_bytes)

    grid_spec = pltpu.PrefetchScalarGridSpec(
        num_scalar_prefetch=0,
        grid=(B,),
        in_specs=[
            pl.BlockSpec((1, Np, Np), lambda b: (b, 0, 0)),          # A_hat[b]
            pl.BlockSpec((1, Gp, Np), lambda b: (b, 0, 0)),          # pool_mat[b]
            pl.BlockSpec((1, Np, Fp), lambda b: (b, 0, 0)),          # X[b]
            pl.BlockSpec((Fp, Hp), lambda b: (0, 0)),                # w1 (resident)
            pl.BlockSpec((3, Hp, Hp), lambda b: (0, 0, 0)),          # stacked w2,w3,wf1
            pl.BlockSpec((8, Hp), lambda b: (0, 0)),                 # stacked shifts
            pl.BlockSpec((Hp, Op), lambda b: (0, 0)),                # wf2
            pl.BlockSpec((1, Op), lambda b: (0, 0)),                 # bf2
        ],
        out_specs=pl.BlockSpec((1, Gp, Op), lambda b: (b, 0, 0)),
    )

    return pl.pallas_call(
        gnn_kernel,
        out_shape=jax.ShapeDtypeStruct((B, Gp, Op), jnp.float32),
        grid_spec=grid_spec,
        cost_estimate=cost,
        compiler_params=pltpu.CompilerParams(
            dimension_semantics=("parallel",),                       # shards across v7x's 2 TCs
            vmem_limit_bytes=int(vmem_limit)),
    )(*args)


# ----------------------------------------------------------------------------- graph utils

def build_norm_adj(edge_index, num_nodes):
    """Dense GCN-normalized adjacency: D^-1/2 (A + I) D^-1/2."""
    src, dst = edge_index
    a = jnp.zeros((num_nodes, num_nodes), jnp.float32)
    a = a.at[dst, src].set(1.0)                                      # message j -> i
    a = jnp.maximum(a, jnp.eye(num_nodes, dtype=jnp.float32))        # self-loops (idempotent)
    deg = a.sum(axis=1)
    d_inv_sqrt = jnp.where(deg > 0, 1.0 / jnp.sqrt(deg), 0.0)
    return d_inv_sqrt[:, None] * a * d_inv_sqrt[None, :]


def build_mean_pool(batch, num_graphs):
    """P[g, i] = 1/|graph g| if node i belongs to graph g."""
    one_hot = jax.nn.one_hot(batch, num_graphs, dtype=jnp.float32).T   # [G, N]
    counts = jnp.maximum(one_hot.sum(axis=1, keepdims=True), 1.0)
    return one_hot / counts


def init_params(key, input_dim, hidden_dim, output_dim, eps=1e-5):
    """Deterministic init.  BatchNorm expressed as (scale, shift) from fresh running stats
    (mean=0, var=1), gamma=1, beta=0 (PyTorch defaults)."""
    ks = jax.random.split(key, 5)

    def lin(k, fan_in, fan_out):
        bound = 1.0 / jnp.sqrt(fan_in)
        kw, kb = jax.random.split(k)
        w = jax.random.uniform(kw, (fan_in, fan_out), jnp.float32, -bound, bound)
        b = jax.random.uniform(kb, (1, fan_out), jnp.float32, -bound, bound)
        return w, b

    def bn(dim):
        gamma = jnp.ones((1, dim), jnp.float32)
        beta = jnp.zeros((1, dim), jnp.float32)
        rmean = jnp.zeros((1, dim), jnp.float32)
        rvar = jnp.ones((1, dim), jnp.float32)
        scale = gamma / jnp.sqrt(rvar + eps)
        shift = beta - rmean * scale
        return scale, shift

    p = {}
    p["w1"], p["b1"] = lin(ks[0], input_dim, hidden_dim)
    p["s1"], p["t1"] = bn(hidden_dim)
    p["w2"], p["b2"] = lin(ks[1], hidden_dim, hidden_dim)
    p["s2"], p["t2"] = bn(hidden_dim)
    p["w3"], p["b3"] = lin(ks[2], hidden_dim, hidden_dim)
    p["s3"], p["t3"] = bn(hidden_dim)
    p["wf1"], p["bf1"] = lin(ks[3], hidden_dim, hidden_dim)
    p["s4"], p["t4"] = bn(hidden_dim)
    p["wf2"], p["bf2"] = lin(ks[4], hidden_dim, output_dim)
    return p


def reference_forward(a_hat, pool_mat, x, params):
    """Pure-JAX f32 reference (eval-mode module semantics)."""
    def leaky(h):
        return jnp.where(h > 0, h, 0.1 * h)

    def layer(h, a, w, b, s, t):
        return leaky((a @ (h @ w) + b) * s + t)

    outs = []
    for b in range(a_hat.shape[0]):
        h, a = x[b], a_hat[b]
        h = layer(h, a, params["w1"], params["b1"], params["s1"], params["t1"])
        h = layer(h, a, params["w2"], params["b2"], params["s2"], params["t2"])
        h = layer(h, a, params["w3"], params["b3"], params["s3"], params["t3"])
        pooled = pool_mat[b] @ h
        z = leaky((pooled @ params["wf1"] + params["bf1"]) * params["s4"] + params["t4"])
        outs.append(z @ params["wf2"] + params["bf2"])
    return jnp.stack(outs)


# ----------------------------------------------------------------------------- demo

if __name__ == "__main__":
    key = jax.random.PRNGKey(0)
    B = 2                                  # independent graph-batches per pallas_call
    N, E, G = 64, 192, 4                   # nodes, edges, graphs per batch
    input_dim, hidden_dim, output_dim = 16, 32, 8

    k_p, k_data = jax.random.split(key)
    params = init_params(k_p, input_dim, hidden_dim, output_dim)

    a_list, p_list, x_list = [], [], []
    for b in range(B):
        kb = jax.random.fold_in(k_data, b)
        k_x, k_e = jax.random.split(kb)
        x = jax.random.normal(k_x, (N, input_dim), jnp.float32)
        src = jax.random.randint(k_e, (E,), 0, N)
        dst = jax.random.randint(jax.random.fold_in(k_e, 1), (E,), 0, N)
        edge_index = jnp.stack([jnp.concatenate([src, dst]),
                                jnp.concatenate([dst, src])], axis=0)
        batch = jnp.repeat(jnp.arange(G, dtype=jnp.int32), N // G)
        a_list.append(build_norm_adj(edge_index, N))
        p_list.append(build_mean_pool(batch, G))
        x_list.append(x)

    a_hat = jnp.stack(a_list)              # [B, N, N]
    pool_mat = jnp.stack(p_list)           # [B, G, N]
    xs = jnp.stack(x_list)                 # [B, N, Fin]

    # One-time (cold-path) packing: pad + cast weights and inputs.
    kparams = prepare_params(params)
    a_pad, p_pad, x_pad = prepare_batch(a_hat, pool_mat, xs)

    out_pad = jax.jit(gnn_forward)(a_pad, p_pad, x_pad, kparams)
    out = out_pad[:, :G, :output_dim]
    jax.block_until_ready(out)

    ref = reference_forward(a_hat, pool_mat, xs, params)
    assert out.shape == (B, G, output_dim)
    max_err = float(jnp.max(jnp.abs(out - ref)))
    assert jnp.allclose(out, ref, atol=0.1, rtol=0.1), f"max |err| = {max_err}"
    print("KERNEL_OK")
</pallas_src>

<mosaic_0001>
module attributes {stable_mosaic.version = 11 : i64} {
  func.func @gnn_kernel(%arg0: i32, %arg1: memref<1x128x128xbf16, #tpu.memory_space<vmem>>, %arg2: memref<1x8x128xf32, #tpu.memory_space<vmem>>, %arg3: memref<1x128x128xbf16, #tpu.memory_space<vmem>>, %arg4: memref<128x128xbf16, #tpu.memory_space<vmem>>, %arg5: memref<3x128x128xbf16, #tpu.memory_space<vmem>>, %arg6: memref<8x128xf32, #tpu.memory_space<vmem>>, %arg7: memref<128x128xbf16, #tpu.memory_space<vmem>>, %arg8: memref<1x128xf32, #tpu.memory_space<vmem>>, %arg9: memref<1x8x128xf32, #tpu.memory_space<vmem>>) attributes {dimension_semantics = [#tpu.dimension_semantics<parallel>], iteration_bounds = array<i64: 2>, scalar_prefetch = 0 : i64, scratch_operands = 0 : i64, tpu.core_type = #tpu.core_type<tc>, window_params = [{transform_indices = @transform_0, window_bounds = array<i64: 1, 128, 128>}, {transform_indices = @transform_1, window_bounds = array<i64: 1, 8, 128>}, {transform_indices = @transform_2, window_bounds = array<i64: 1, 128, 128>}, {pipeline_mode = #tpu.pipeline_mode<synchronous>, transform_indices = @transform_3, window_bounds = array<i64: 128, 128>}, {pipeline_mode = #tpu.pipeline_mode<synchronous>, transform_indices = @transform_4, window_bounds = array<i64: 3, 128, 128>}, {pipeline_mode = #tpu.pipeline_mode<synchronous>, transform_indices = @transform_5, window_bounds = array<i64: 8, 128>}, {pipeline_mode = #tpu.pipeline_mode<synchronous>, transform_indices = @transform_6, window_bounds = array<i64: 128, 128>}, {pipeline_mode = #tpu.pipeline_mode<synchronous>, transform_indices = @transform_7, window_bounds = array<i64: 1, 128>}, {transform_indices = @transform_8, window_bounds = array<i64: 1, 8, 128>}]} {
    %c0 = arith.constant 0 : index
    %c0_0 = arith.constant 0 : index
    %c0_1 = arith.constant 0 : index
    %0 = vector.load %arg1[%c0, %c0_0, %c0_1] : memref<1x128x128xbf16, #tpu.memory_space<vmem>>, vector<1x128x128xbf16>
    %1 = vector.shape_cast %0 : vector<1x128x128xbf16> to vector<128x128xbf16>
    %c0_2 = arith.constant 0 : index
    %c0_3 = arith.constant 0 : index
    %c0_4 = arith.constant 0 : index
    %2 = vector.load %arg3[%c0_2, %c0_3, %c0_4] : memref<1x128x128xbf16, #tpu.memory_space<vmem>>, vector<1x128x128xbf16>
    %3 = vector.shape_cast %2 : vector<1x128x128xbf16> to vector<128x128xbf16>
    %c0_5 = arith.constant 0 : index
    %c0_6 = arith.constant 0 : index
    %4 = vector.load %arg4[%c0_5, %c0_6] : memref<128x128xbf16, #tpu.memory_space<vmem>>, vector<128x128xbf16>
    %c0_7 = arith.constant 0 : index
    %c0_8 = arith.constant 0 : index
    %5 = vector.load %arg6[%c0_7, %c0_8] : memref<8x128xf32, #tpu.memory_space<vmem>>, vector<1x128xf32>
    %cst = arith.constant dense<0.000000e+00> : vector<128x128xf32>
    %6 = tpu.matmul %3, %4, %cst {dimension_numbers = #tpu.dot_dimension_numbers<[1], [0], [0], [1], [0, 0, 1, 1], [], []>} : vector<128x128xbf16>, vector<128x128xbf16>, vector<128x128xf32> -> vector<128x128xf32>
    %7 = arith.truncf %6 : vector<128x128xf32> to vector<128x128xbf16>
    %cst_9 = arith.constant dense<0.000000e+00> : vector<128x128xf32>
    %8 = tpu.matmul %1, %7, %cst_9 {dimension_numbers = #tpu.dot_dimension_numbers<[1], [0], [0], [1], [0, 0, 1, 1], [], []>} : vector<128x128xbf16>, vector<128x128xbf16>, vector<128x128xf32> -> vector<128x128xf32>
    %9 = vector.broadcast %5 : vector<1x128xf32> to vector<128x128xf32>
    %10 = arith.addf %8, %9 : vector<128x128xf32>
    %cst_10 = arith.constant 1.000000e-01 : f32
    %11 = vector.broadcast %cst_10 : f32 to vector<128x128xf32>
    %12 = arith.mulf %11, %10 : vector<128x128xf32>
    %13 = arith.maximumf %10, %12 : vector<128x128xf32>
    %14 = arith.truncf %13 : vector<128x128xf32> to vector<128x128xbf16>
    %c0_11 = arith.constant 0 : index
    %c0_12 = arith.constant 0 : index
    %c0_13 = arith.constant 0 : index
    %15 = vector.load %arg5[%c0_11, %c0_12, %c0_13] : memref<3x128x128xbf16, #tpu.memory_space<vmem>>, vector<1x128x128xbf16>
    %16 = vector.shape_cast %15 : vector<1x128x128xbf16> to vector<128x128xbf16>
    %c1 = arith.constant 1 : index
    %c0_14 = arith.constant 0 : index
    %17 = vector.load %arg6[%c1, %c0_14] : memref<8x128xf32, #tpu.memory_space<vmem>>, vector<1x128xf32>
    %cst_15 = arith.constant dense<0.000000e+00> : vector<128x128xf32>
    %18 = tpu.matmul %14, %16, %cst_15 {dimension_numbers = #tpu.dot_dimension_numbers<[1], [0], [0], [1], [0, 0, 1, 1], [], []>} : vector<128x128xbf16>, vector<128x128xbf16>, vector<128x128xf32> -> vector<128x128xf32>
    %19 = arith.truncf %18 : vector<128x128xf32> to vector<128x128xbf16>
    %cst_16 = arith.constant dense<0.000000e+00> : vector<128x128xf32>
    %20 = tpu.matmul %1, %19, %cst_16 {dimension_numbers = #tpu.dot_dimension_numbers<[1], [0], [0], [1], [0, 0, 1, 1], [], []>} : vector<128x128xbf16>, vector<128x128xbf16>, vector<128x128xf32> -> vector<128x128xf32>
    %21 = vector.broadcast %17 : vector<1x128xf32> to vector<128x128xf32>
    %22 = arith.addf %20, %21 : vector<128x128xf32>
    %cst_17 = arith.constant 1.000000e-01 : f32
    %23 = vector.broadcast %cst_17 : f32 to vector<128x128xf32>
    %24 = arith.mulf %23, %22 : vector<128x128xf32>
    %25 = arith.maximumf %22, %24 : vector<128x128xf32>
    %26 = arith.truncf %25 : vector<128x128xf32> to vector<128x128xbf16>
    %c1_18 = arith.constant 1 : index
    %c0_19 = arith.constant 0 : index
    %c0_20 = arith.constant 0 : index
    %27 = vector.load %arg5[%c1_18, %c0_19, %c0_20] : memref<3x128x128xbf16, #tpu.memory_space<vmem>>, vector<1x128x128xbf16>
    %28 = vector.shape_cast %27 : vector<1x128x128xbf16> to vector<128x128xbf16>
    %c2 = arith.constant 2 : index
    %c0_21 = arith.constant 0 : index
    %29 = vector.load %arg6[%c2, %c0_21] : memref<8x128xf32, #tpu.memory_space<vmem>>, vector<1x128xf32>
    %cst_22 = arith.constant dense<0.000000e+00> : vector<128x128xf32>
    %30 = tpu.matmul %26, %28, %cst_22 {dimension_numbers = #tpu.dot_dimension_numbers<[1], [0], [0], [1], [0, 0, 1, 1], [], []>} : vector<128x128xbf16>, vector<128x128xbf16>, vector<128x128xf32> -> vector<128x128xf32>
    %31 = arith.truncf %30 : vector<128x128xf32> to vector<128x128xbf16>
    %cst_23 = arith.constant dense<0.000000e+00> : vector<128x128xf32>
    %32 = tpu.matmul %1, %31, %cst_23 {dimension_numbers = #tpu.dot_dimension_numbers<[1], [0], [0], [1], [0, 0, 1, 1], [], []>} : vector<128x128xbf16>, vector<128x128xbf16>, vector<128x128xf32> -> vector<128x128xf32>
    %33 = vector.broadcast %29 : vector<1x128xf32> to vector<128x128xf32>
    %34 = arith.addf %32, %33 : vector<128x128xf32>
    %cst_24 = arith.constant 1.000000e-01 : f32
    %35 = vector.broadcast %cst_24 : f32 to vector<128x128xf32>
    %36 = arith.mulf %35, %34 : vector<128x128xf32>
    %37 = arith.maximumf %34, %36 : vector<128x128xf32>
    %c0_25 = arith.constant 0 : index
    %c0_26 = arith.constant 0 : index
    %c0_27 = arith.constant 0 : index
    %38 = vector.load %arg2[%c0_25, %c0_26, %c0_27] : memref<1x8x128xf32, #tpu.memory_space<vmem>>, vector<1x8x128xf32>
    %39 = vector.shape_cast %38 : vector<1x8x128xf32> to vector<8x128xf32>
    %cst_28 = arith.constant dense<0.000000e+00> : vector<8x128xf32>
    %40 = tpu.matmul %39, %37, %cst_28 {dimension_numbers = #tpu.dot_dimension_numbers<[1], [0], [0], [1], [0, 0, 1, 1], [], []>} : vector<8x128xf32>, vector<128x128xf32>, vector<8x128xf32> -> vector<8x128xf32>
    %41 = arith.truncf %40 : vector<8x128xf32> to vector<8x128xbf16>
    %c2_29 = arith.constant 2 : index
    %c0_30 = arith.constant 0 : index
    %c0_31 = arith.constant 0 : index
    %42 = vector.load %arg5[%c2_29, %c0_30, %c0_31] : memref<3x128x128xbf16, #tpu.memory_space<vmem>>, vector<1x128x128xbf16>
    %43 = vector.shape_cast %42 : vector<1x128x128xbf16> to vector<128x128xbf16>
    %cst_32 = arith.constant dense<0.000000e+00> : vector<8x128xf32>
    %44 = tpu.matmul %41, %43, %cst_32 {dimension_numbers = #tpu.dot_dimension_numbers<[1], [0], [0], [1], [0, 0, 1, 1], [], []>} : vector<8x128xbf16>, vector<128x128xbf16>, vector<8x128xf32> -> vector<8x128xf32>
    %c3 = arith.constant 3 : index
    %c0_33 = arith.constant 0 : index
    %45 = vector.load %arg6[%c3, %c0_33] : memref<8x128xf32, #tpu.memory_space<vmem>>, vector<1x128xf32>
    %46 = vector.broadcast %45 : vector<1x128xf32> to vector<8x128xf32>
    %47 = arith.addf %44, %46 : vector<8x128xf32>
    %cst_34 = arith.constant 1.000000e-01 : f32
    %48 = vector.broadcast %cst_34 : f32 to vector<8x128xf32>
    %49 = arith.mulf %48, %47 : vector<8x128xf32>
    %50 = arith.maximumf %47, %49 : vector<8x128xf32>
    %51 = arith.truncf %50 : vector<8x128xf32> to vector<8x128xbf16>
    %c0_35 = arith.constant 0 : index
    %c0_36 = arith.constant 0 : index
    %52 = vector.load %arg7[%c0_35, %c0_36] : memref<128x128xbf16, #tpu.memory_space<vmem>>, vector<128x128xbf16>
    %cst_37 = arith.constant dense<0.000000e+00> : vector<8x128xf32>
    %53 = tpu.matmul %51, %52, %cst_37 {dimension_numbers = #tpu.dot_dimension_numbers<[1], [0], [0], [1], [0, 0, 1, 1], [], []>} : vector<8x128xbf16>, vector<128x128xbf16>, vector<8x128xf32> -> vector<8x128xf32>
    %c0_38 = arith.constant 0 : index
    %c0_39 = arith.constant 0 : index
    %54 = vector.load %arg8[%c0_38, %c0_39] : memref<1x128xf32, #tpu.memory_space<vmem>>, vector<1x128xf32>
    %55 = vector.broadcast %54 : vector<1x128xf32> to vector<8x128xf32>
    %56 = arith.addf %53, %55 : vector<8x128xf32>
    %c0_40 = arith.constant 0 : index
    %c0_41 = arith.constant 0 : index
    %c0_42 = arith.constant 0 : index
    %57 = vector.load %arg9[%c0_40, %c0_41, %c0_42] : memref<1x8x128xf32, #tpu.memory_space<vmem>>, vector<1x8x128xf32>
    %58 = vector.shape_cast %57 : vector<1x8x128xf32> to vector<8x128xf32>
    %59 = vector.shape_cast %56 : vector<8x128xf32> to vector<1x8x128xf32>
    tpu.vector_store %arg9[%c0_40, %c0_41, %c0_42], %59 {strides = array<i32>} : memref<1x8x128xf32, #tpu.memory_space<vmem>>, vector<1x8x128xf32>,
    return
  }
  func.func @transform_0(%arg0: i32) -> (i32, i32, i32) {
    %c0_i32 = arith.constant 0 : i32
    %c0_i32_0 = arith.constant 0 : i32
    %c0_i32_1 = arith.constant 0 : i32
    return %arg0, %c0_i32, %c0_i32_0 : i32, i32, i32
  }
  func.func @transform_1(%arg0: i32) -> (i32, i32, i32) {
    %c0_i32 = arith.constant 0 : i32
    %c0_i32_0 = arith.constant 0 : i32
    %c0_i32_1 = arith.constant 0 : i32
    return %arg0, %c0_i32, %c0_i32_0 : i32, i32, i32
  }
  func.func @transform_2(%arg0: i32) -> (i32, i32, i32) {
    %c0_i32 = arith.constant 0 : i32
    %c0_i32_0 = arith.constant 0 : i32
    %c0_i32_1 = arith.constant 0 : i32
    return %arg0, %c0_i32, %c0_i32_0 : i32, i32, i32
  }
  func.func @transform_3(%arg0: i32) -> (i32, i32) {
    %c0_i32 = arith.constant 0 : i32
    %c0_i32_0 = arith.constant 0 : i32
    %c0_i32_1 = arith.constant 0 : i32
    return %c0_i32, %c0_i32_0 : i32, i32
  }
  func.func @transform_4(%arg0: i32) -> (i32, i32, i32) {
    %c0_i32 = arith.constant 0 : i32
    %c0_i32_0 = arith.constant 0 : i32
    %c0_i32_1 = arith.constant 0 : i32
    %c0_i32_2 = arith.constant 0 : i32
    return %c0_i32, %c0_i32_0, %c0_i32_1 : i32, i32, i32
  }
  func.func @transform_5(%arg0: i32) -> (i32, i32) {
    %c0_i32 = arith.constant 0 : i32
    %c0_i32_0 = arith.constant 0 : i32
    %c0_i32_1 = arith.constant 0 : i32
    return %c0_i32, %c0_i32_0 : i32, i32
  }
  func.func @transform_6(%arg0: i32) -> (i32, i32) {
    %c0_i32 = arith.constant 0 : i32
    %c0_i32_0 = arith.constant 0 : i32
    %c0_i32_1 = arith.constant 0 : i32
    return %c0_i32, %c0_i32_0 : i32, i32
  }
  func.func @transform_7(%arg0: i32) -> (i32, i32) {
    %c0_i32 = arith.constant 0 : i32
    %c0_i32_0 = arith.constant 0 : i32
    %c0_i32_1 = arith.constant 0 : i32
    return %c0_i32, %c0_i32_0 : i32, i32
  }
  func.func @transform_8(%arg0: i32) -> (i32, i32, i32) {
    %c0_i32 = arith.constant 0 : i32
    %c0_i32_0 = arith.constant 0 : i32
    %c0_i32_1 = arith.constant 0 : i32
    return %arg0, %c0_i32, %c0_i32_0 : i32, i32, i32
  }
}

</mosaic_0001>

<bundles_post_ra>
// kernel: gnn_forward.1
= control target key start
LH: loop header
LB: loop body
LE: loop exit
PB: predicated region body
PF: predicated region fallthrough
CT: control target
= control target key end

     0   :  { %s3426_s0 = inlined_call_operand.hbm [shape: bf16[2,128,128], index: 0, kind: input, shape index: {}]   ;;  %s3427_s1 = inlined_call_operand.hbm [shape: f32[2,8,128], index: 1, kind: input, shape index: {}]   ;;  %s3428_s2 = inlined_call_operand.hbm [shape: bf16[2,128,128], index: 2, kind: input, shape index: {}]   ;;  %s3429_s3 = inlined_call_operand.hbm [shape: bf16[128,128], index: 3, kind: input, shape index: {}]   ;;  %s3430_s4 = inlined_call_operand.hbm [shape: bf16[3,128,128], index: 4, kind: input, shape index: {}]   ;;  %s3431_s5 = inlined_call_operand.vmem [shape: f32[8,128], index: 5, kind: input, shape index: {}]   ;;  %s3432_s6 = inlined_call_operand.hbm [shape: bf16[128,128], index: 6, kind: input, shape index: {}]   ;;  %s3433_s7 = inlined_call_operand.vmem [shape: f32[1,128], index: 7, kind: input, shape index: {}]   ;;  %s3434_s8 = inlined_call_operand.hbm [shape: f32[2,8,128], index: 8, kind: output, shape index: {}]  }
   0x1   :  { %3459 = sst [smem:[#allocation25_spill]] %s3427_s1 }
   0x2   :  { %3460 = sst [smem:[#allocation26_spill]] %s3429_s3 }
   0x3   :  { %3461 = sst [smem:[#allocation27_spill]] %s3433_s7 }
   0x4   :  { %3462 = sst [smem:[#allocation28_spill]] %s3434_s8 }
   0x5   :  { %13 = vsyncpa [#allocation3], 0 }
   0x6   :  { %15 = vsyncpa [#allocation3 + $0x1], 0 }
   0x7   :  { %16 = vsyncpa [#allocation6], 0 }
   0x8   :  { %18 = vsyncpa [#allocation6 + $0x1], 0 }
   0x9   :  { %19 = vsyncpa [#allocation9], 0 }
   0xa   :  { %20 = vsyncpa [#allocation12], 0 }
   0xb   :  { %21 = vsyncpa [#allocation4], 0 }
   0xc   :  { %23 = vsyncpa [#allocation4 + $0x1], 0  ;;  %s2920_s27 = smov 0   ;;  %s2922_s28 = smov 0  }
   0xd   :  { %s2924_s29 = smov 0   ;;  %s2926_s30 = smov 0  }
   0xe LB: > { %3463 = sst [smem:[#allocation19_spill]] %s2849_s27  ;;  %s2941_s9 = sadd.s32 4294967295, %s2861_s30   ;;  %s2861_s30 = sphi %s2926_s30, %s3502_s30   ;;  %s2857_s29 = sphi %s2924_s29, %s3504_s29   ;;  %s2853_s28 = sphi %s2922_s28, %s3506_s28   ;;  %s2849_s27 = sphi %s2920_s27, %s3505_s27  }
   0xf   : > { %3464 = sst [smem:[#allocation20_spill]] %s2857_s29  ;;  %s1950_s10 = sadd.s32 4294967294, %s2861_s30  }
  0x10   : > { %p49_p0 = scmp.ne.s32.totalorder %s2853_s28, %s2849_s27  ;;  %p3435_p1 = scmp.eq.s32.totalorder %s2941_s9, 0 }
  0x11   : > { %p236_p3 = scmp.eq.s32.totalorder %s1950_s10, 1  ;;  %p1951_p5 = scmp.ge.s32.totalorder %s2861_s30, 1 }
  0x12   : > { %p2950_p4 = por %p3435_p1, %p49_p0  ;;  %p243_p7 = scmp.lt.s32.totalorder %s2861_s30, 3 }
  0x13   : > { %p2955_p6 = por %p236_p3, %p49_p0  ;;  %s2863_s14 = smov [#allocation8]  }
  0x14   : > { %s3465_s11 = scalar_select %p2950_p4, 1, 0 }
  0x15   : > { %s3466_s12 = scalar_select %p2955_p6, 1, 0 }
  0x16   : > { %p2960_p8 = pnand %p1951_p5, %p243_p7  ;;  %s255_s15 = sshll.u32 %s2863_s14, 4  ;;  %s2964_s15 = int_to_ptr.vmem [resolvable:$true] %s255_s15 }
  0x17   : > { %3467 = sst [smem:[#allocation21_spill]] %s3466_s12  ;;  %s2976_s17 = sadd.s32 1, %s2861_s30  }
  0x18   : > { %s3468_s13 = scalar_select %p2960_p8, 1, 0 }
  0x19   : > { %p2481_p9 = pneg %p2960_p8  ;;  %3470 = sst [smem:[#allocation22_spill]] %s2976_s17 }
  0x1a   : > { %s36_s18 = sadd.s32 1, %s2857_s29  ;;  %s33_s19 = ssub.s32 %s2861_s30, %s2976_s17 }
  0x1b   : > { %p2971_p11 = pnand %p2481_p9, %p3435_p1  ;;  %s3471_s3 = sld [smem:[#allocation26_spill]] }
  0x1d   : > { %s3469_s16 = scalar_select %p2971_p11, 1, 0 }
  0x1e   : > { %p2989_p13 = pneg %p2971_p11 }
  0x20   : > { %s3472_s25 = scalar_select %p2989_p13, 1, 0 }
  0x21   : > { %s2609_s22 = scalar_lea.hbm %s3471_s3, 1024 }
  0x22   : > { %p2610_p12 = scmp.ne.s32.totalorder %s3471_s3, %s2609_s22  ;;  %p2616_p5 = scmp.lt.u32.totalorder %s2609_s22, %s3471_s3 }
  0x24   : > { %p2612_p0 = pnand %p2989_p13, %p2610_p12 }
  0x26   : > { %p2613_p3 = pneg %p2612_p0 }
  0x28   : > { %p2618_p7 = pnand %p2616_p5, %p2613_p3 }
  0x2a   : > { %2621 = shalt.err (!%p2618_p7)
}
  0x2b   : > { %s2622_s14 = scalar_lea.vmem %s2964_s15, 1024  ;;  %p2630_p2 = scmp.lt.s32.totalorder %s2964_s15, %s2964_s15 }
  0x2c   : > { %p2623_p9 = scmp.ne.s32.totalorder %s2964_s15, %s2622_s14  ;;  %p2631_p6 = scmp.lt.s32.totalorder %s2622_s14, %s2622_s14 }
  0x2e   : > { %p2625_p10 = pnand %p2623_p9, %p2989_p13  ;;  %p2632_p12 = por %p2631_p6, %p2630_p2 }
  0x30   : > { %p2626_p1 = pneg %p2625_p10 }
  0x32   : > { %p2633_p0 = pnand %p2632_p12, %p2626_p1 }
  0x34   : > { %2636 = shalt.err (!%p2633_p0)
}
  0x35   : > { %s3438_s20 = smov 64   ;;  %s3440_s21 = smov 4  }
  0x36   : > { %2484 = dma.hbm_to_vmem [thread:$0]  (!%p2971_p11), %s3471_s3, 1024, %s2964_s15, [#allocation9], %s3438_s20, %s3438_s20, %s3440_s21  }
  0x37   : > { %p34_p1 = scmp.eq.s32.totalorder %s33_s19, 0  ;;  %p43_p2 = scmp.ne.s32.totalorder %s2857_s29, %s2853_s28 }
  0x38   : > { %p44_p6 = scmp.eq.s32.totalorder %s2861_s30, 0  ;;  %p2508_p10 = scmp.lt.s32.totalorder %s2861_s30, 2 }
  0x39   : > { %s3018_s24 = scalar_select %p34_p1, %s2857_s29, %s36_s18  }
  0x3a   : > { %p45_p3 = por %p44_p6, %p43_p2  ;;  %p3474_p5 = scmp.eq.s32.totalorder %s2941_s9, 1 }
  0x3b   : > { %3473 = sst [smem:[#allocation23_spill]] %s3018_s24  ;;  %s3027_s10 = sand.u32 1, %s2857_s29  }
  0x3c   : > { %p3022_p7 = por %p3474_p5, %p43_p2  ;;  %s322_s14 = sand.u32 1, %s2861_s30  }
  0x3d   : > { %p3031_p9 = pnand %p2508_p10, %p45_p3  ;;  %s1959_s19 = sshll.u32 %s3027_s10, 3 }
  0x3e   : > { %s3475_s26 = scalar_select %p3022_p7, 1, 0 }
  0x3f   : > { %s3477_s15 = scalar_select %p3031_p9, 1, 0 }
  0x40   : > { %3476 = sst [smem:[#allocation24_spill]] %s3475_s26  ;;  %s1960_s18 = sshll.u32 %s2861_s30, 7 }
  0x41   : > { %s326_s22 = scalar_lea.vmem [#allocation5], %s1959_s19  ;;  %s3478_s1 = sld [smem:[#allocation25_spill]] }
  0x42   : > { %s333_s23 = sshll.u32 %s326_s22, 4  ;;  %s3044_s17 = scalar_lea.sflag [#allocation6], %s322_s14  ;;  %s3042_s23 = int_to_ptr.vmem [resolvable:$true] %s333_s23 }
  0x43   : > { %p3050_p0 = pneg %p3031_p9 }
  0x45   : > { %s3479_s29 = scalar_select %p3050_p0, 1, 0 }
  0x47   : > { %s3040_s3 = scalar_lea.hbm %s3478_s1, %s1960_s18  ;;  %s2642_s19 = scalar_lea.hbm %s3478_s1, 256 }
  0x48   : > { %s2637_s24 = scalar_lea.hbm %s3040_s3, 128  ;;  %p2643_p6 = scmp.lt.u32.totalorder %s3040_s3, %s3478_s1 }
  0x49   : > { %p2638_p12 = scmp.ne.s32.totalorder %s3040_s3, %s2637_s24  ;;  %p2644_p10 = scmp.lt.u32.totalorder %s2642_s19, %s2637_s24 }
  0x4a   : > { %p2646_p5 = scmp.lt.u32.totalorder %s2637_s24, %s3040_s3 }
  0x4b   : > { %p2640_p1 = pnand %p3050_p0, %p2638_p12  ;;  %p2645_p3 = por %p2644_p10, %p2643_p6 }
  0x4d   : > { %p2641_p2 = pneg %p2640_p1  ;;  %p2647_p7 = por %p2646_p5, %p2645_p3 }
  0x4f   : > { %p2648_p4 = pnand %p2647_p7, %p2641_p2 }
  0x51   : > { %2651 = shalt.err (!%p2648_p4)
}
  0x52   : > { %s2652_s14 = scalar_lea.vmem %s3042_s23, 128  ;;  %s2866_s20 = smov [#allocation5]  }
  0x53   : > { %p2653_p12 = scmp.ne.s32.totalorder %s3042_s23, %s2652_s14  ;;  %s2657_s21 = sshll.u32 %s2866_s20, 4  ;;  %s2658_s21 = int_to_ptr.vmem [resolvable:$false] %s2657_s21 }
  0x54   : > { %s2659_s18 = scalar_lea.vmem %s2658_s21, 256  ;;  %p2660_p11 = scmp.lt.s32.totalorder %s3042_s23, %s2658_s21 }
  0x55   : > { %p2655_p1 = pnand %p2653_p12, %p3050_p0  ;;  %p2661_p13 = scmp.lt.s32.totalorder %s2659_s18, %s2652_s14 }
  0x57   : > { %p2656_p8 = pneg %p2655_p1  ;;  %p2662_p6 = por %p2661_p13, %p2660_p11 }
  0x59   : > { %p2663_p10 = pnand %p2662_p6, %p2656_p8 }
  0x5b   : > { %2666 = shalt.err (!%p2663_p10)
}
  0x5c   : > { %2497 = dma.hbm_to_vmem [thread:$0]  (!%p3031_p9), %s3040_s3, 128, %s3042_s23, %s3044_s17  }
  0x5d   : > { %s3480_s24 = sshll.u32 %s3027_s10, 6  ;;  %s2867_s1 = smov [#allocation10]  }
  0x5e   : > { %s344_s19 = scalar_lea.vmem [#allocation7], %s3480_s24  ;;  %s268_s20 = sshll.u32 %s2867_s1, 4  ;;  %s269_s20 = int_to_ptr.vmem [resolvable:$true] %s268_s20 }
  0x5f   : > { %s351_s22 = sshll.u32 %s344_s19, 4  ;;  %s2667_s18 = scalar_lea.hbm %s3430_s4, 3072  ;;  %s3076_s22 = int_to_ptr.vmem [resolvable:$true] %s351_s22 }
  0x60   : > { %p2668_p4 = scmp.ne.s32.totalorder %s3430_s4, %s2667_s18  ;;  %p3481_p8 = scmp.ne.s32.totalorder %s3472_s25, 0 }
  0x61   : > { %p2674_p7 = scmp.lt.u32.totalorder %s2667_s18, %s3430_s4 }
  0x62   : > { %p2670_p11 = pnand %p2668_p4, %p3481_p8 }
  0x64   : > { %p2671_p13 = pneg %p2670_p11 }
  0x66   : > { %p2676_p2 = pnand %p2674_p7, %p2671_p13 }
  0x68   : > { %2679 = shalt.err (!%p2676_p2)
}
  0x69   : > { %s2680_s1 = scalar_lea.vmem %s269_s20, 3072  ;;  %p2688_p1 = scmp.lt.s32.totalorder %s269_s20, %s269_s20 }
  0x6a   : > { %p2681_p3 = scmp.ne.s32.totalorder %s269_s20, %s2680_s1  ;;  %p2689_p6 = scmp.lt.s32.totalorder %s2680_s1, %s2680_s1 }
  0x6c   : > { %p2683_p5 = pnand %p2681_p3, %p3481_p8  ;;  %p2690_p10 = por %p2689_p6, %p2688_p1 }
  0x6e   : > { %p2684_p12 = pneg %p2683_p5 }
  0x70   : > { %p2691_p9 = pnand %p2690_p10, %p2684_p12 }
  0x72   : > { %2694 = shalt.err (!%p2691_p9)
}
  0x73   : > { %p3482_p4 = scmp.ne.s32.totalorder %s3469_s16, 0  ;;  %s3483_s27 = smov 4  }
  0x74   : > { %s3484_s12 = smov 64   ;;  %s2868_s14 = smov [#allocation11]  }
  0x75   : > { %2487 = dma.hbm_to_vmem [thread:$0]  (!%p3482_p4), %s3430_s4, 3072, %s269_s20, [#allocation9], %s3484_s12, %s3484_s12, %s3483_s27  }
  0x76   : > { %s284_s21 = sshll.u32 %s2868_s14, 4  ;;  %s2037_s18 = sshll.u32 %s2861_s30, 10  ;;  %s285_s21 = int_to_ptr.vmem [resolvable:$true] %s284_s21 }
  0x77   : > { %s2695_s1 = scalar_lea.hbm %s3432_s6, 1024 }
  0x78   : > { %p2696_p9 = scmp.ne.s32.totalorder %s3432_s6, %s2695_s1  ;;  %p2702_p7 = scmp.lt.u32.totalorder %s2695_s1, %s3432_s6 }
  0x7a   : > { %p2698_p11 = pnand %p2696_p9, %p3481_p8 }
  0x7c   : > { %p2699_p13 = pneg %p2698_p11 }
  0x7e   : > { %p2704_p2 = pnand %p2702_p7, %p2699_p13 }
  0x80   : > { %2707 = shalt.err (!%p2704_p2)
}
  0x81   : > { %s2708_s20 = scalar_lea.vmem %s285_s21, 1024  ;;  %p2716_p1 = scmp.lt.s32.totalorder %s285_s21, %s285_s21 }
  0x82   : > { %p2709_p3 = scmp.ne.s32.totalorder %s285_s21, %s2708_s20  ;;  %p2717_p6 = scmp.lt.s32.totalorder %s2708_s20, %s2708_s20 }
  0x84   : > { %p2711_p5 = pnand %p2709_p3, %p3481_p8  ;;  %p2718_p10 = por %p2717_p6, %p2716_p1 }
  0x86   : > { %p2712_p12 = pneg %p2711_p5 }
  0x88   : > { %p2719_p0 = pnand %p2718_p10, %p2712_p12 }
  0x8a   : > { %2722 = shalt.err (!%p2719_p0)
}
  0x8b   : > { %2490 = dma.hbm_to_vmem [thread:$0]  (!%p3482_p4), %s3432_s6, 1024, %s285_s21, [#allocation12], %s3484_s12, %s3484_s12, %s3483_s27  }
  0x8c   : > { %s3124_s19 = scalar_lea.hbm %s3426_s0, %s2037_s18  ;;  %s3485_s14 = sshll.u32 %s3027_s10, 6 }
  0x8d   : > { %s305_s16 = scalar_lea.vmem [#allocation2], %s3485_s14  ;;  %s3133_s24 = scalar_lea.hbm %s3428_s2, %s2037_s18 }
  0x8e   : > { %s312_s3 = sshll.u32 %s305_s16, 4  ;;  %s302_s21 = scalar_lea.sflag [#allocation3], %s3027_s10  ;;  %s3128_s3 = int_to_ptr.vmem [resolvable:$true] %s312_s3 }
  0x8f   : > { %s2723_s20 = scalar_lea.hbm %s3124_s19, 1024  ;;  %p3486_p8 = scmp.ne.s32.totalorder %s3479_s29, 0 }
  0x90   : > { %p2724_p0 = scmp.ne.s32.totalorder %s3124_s19, %s2723_s20  ;;  %s2728_s25 = scalar_lea.hbm %s3426_s0, 2048 }
  0x91   : > { %p2729_p11 = scmp.lt.u32.totalorder %s3124_s19, %s3426_s0  ;;  %p2730_p13 = scmp.lt.u32.totalorder %s2728_s25, %s2723_s20 }
  0x92   : > { %p2726_p4 = pnand %p2724_p0, %p3486_p8  ;;  %p2732_p2 = scmp.lt.u32.totalorder %s2723_s20, %s3124_s19 }
  0x93   : > { %p2731_p7 = por %p2730_p13, %p2729_p11 }
  0x94   : > { %p2727_p9 = pneg %p2726_p4 }
  0x95   : > { %p2733_p3 = por %p2732_p2, %p2731_p7 }
  0x97   : > { %p2734_p5 = pnand %p2733_p3, %p2727_p9 }
  0x99   : > { %2737 = shalt.err (!%p2734_p5)
}
  0x9a   : > { %s2738_s18 = scalar_lea.vmem %s3128_s3, 1024  ;;  %s2869_s16 = smov [#allocation2]  }
  0x9b   : > { %p2739_p12 = scmp.ne.s32.totalorder %s3128_s3, %s2738_s18  ;;  %s2743_s23 = sshll.u32 %s2869_s16, 4  ;;  %s2744_s23 = int_to_ptr.vmem [resolvable:$false] %s2743_s23 }
  0x9c   : > { %s2745_s1 = scalar_lea.vmem %s2744_s23, 2048  ;;  %p2746_p10 = scmp.lt.s32.totalorder %s3128_s3, %s2744_s23 }
  0x9d   : > { %p2741_p1 = pnand %p2739_p12, %p3486_p8  ;;  %p2747_p0 = scmp.lt.s32.totalorder %s2745_s1, %s2738_s18 }
  0x9f   : > { %p2742_p6 = pneg %p2741_p1  ;;  %p2748_p4 = por %p2747_p0, %p2746_p10 }
  0xa1   : > { %p2749_p11 = pnand %p2748_p4, %p2742_p6 }
  0xa3   : > { %2752 = shalt.err (!%p2749_p11)
}
  0xa4   : > { %p3487_p9 = scmp.ne.s32.totalorder %s3477_s15, 0  ;;  %s2753_s20 = scalar_lea.hbm %s3133_s24, 1024 }
  0xa5   : > { %p2754_p13 = scmp.ne.s32.totalorder %s3133_s24, %s2753_s20  ;;  %s2758_s25 = scalar_lea.hbm %s3428_s2, 2048 }
  0xa6   : > { %2494 = dma.hbm_to_vmem [thread:$0]  (!%p3487_p9), %s3124_s19, 1024, %s3128_s3, %s302_s21, %s3484_s12, %s3484_s12, %s3483_s27  }
  0xa7   : > { %p2756_p7 = pnand %p2754_p13, %p3486_p8  ;;  %p2759_p3 = scmp.lt.u32.totalorder %s3133_s24, %s3428_s2 }
  0xa8   : > { %p2760_p5 = scmp.lt.u32.totalorder %s2758_s25, %s2753_s20  ;;  %p2762_p1 = scmp.lt.u32.totalorder %s2753_s20, %s3133_s24 }
  0xa9   : > { %p2757_p2 = pneg %p2756_p7 }
  0xaa   : > { %p2761_p12 = por %p2760_p5, %p2759_p3 }
  0xac   : > { %p2763_p6 = por %p2762_p1, %p2761_p12 }
  0xae   : > { %p2764_p10 = pnand %p2763_p6, %p2757_p2 }
  0xb0   : > { %2767 = shalt.err (!%p2764_p10)
}
  0xb1   : > { %s2768_s10 = scalar_lea.vmem %s3076_s22, 1024  ;;  %s2870_s19 = smov [#allocation7]  }
  0xb2   : > { %p2769_p0 = scmp.ne.s32.totalorder %s3076_s22, %s2768_s10  ;;  %s2773_s3 = sshll.u32 %s2870_s19, 4  ;;  %s2774_s3 = int_to_ptr.vmem [resolvable:$false] %s2773_s3 }
  0xb3   : > { %s2775_s21 = scalar_lea.vmem %s2774_s3, 2048  ;;  %p2776_p13 = scmp.lt.s32.totalorder %s3076_s22, %s2774_s3 }
  0xb4   : > { %p2771_p4 = pnand %p2769_p0, %p3486_p8  ;;  %p2777_p7 = scmp.lt.s32.totalorder %s2775_s21, %s2768_s10 }
  0xb6   : > { %p2772_p11 = pneg %p2771_p4  ;;  %p2778_p3 = por %p2777_p7, %p2776_p13 }
  0xb8   : > { %p2779_p5 = pnand %p2778_p3, %p2772_p11 }
  0xba   : > { %2782 = shalt.err (!%p2779_p5)
}
  0xbb   : > { %2500 = dma.hbm_to_vmem [thread:$0]  (!%p3487_p9), %s3133_s24, 1024, %s3076_s22, %s3044_s17, %s3484_s12, %s3484_s12, %s3483_s27  }
  0xbc   : > { %p3488_p8 = scmp.ne.s32.totalorder %s3468_s13, 0 }
  0xbd   : > { %s3190_s29 = sand.u32 (!%p3488_p8), 1, %s2853_s28   ;;  %p3489_p2 = scmp.ne.s32.totalorder (!%p3488_p8), %s3465_s11, 0 }
  0xbe   : > { %363 = sbr.rel (%p3488_p8) target bundleno = 2351 (0x92f), region = 52  ;;  %s1965_s18 = sshll.u32 (!%p3488_p8), %s3190_s29, 6 }
  0xbf   : > { %s366_s16 = scalar_lea.sflag (!%p3488_p8), [#allocation3], %s3190_s29  ;;  %s3194_s23 = scalar_lea.vmem (!%p3488_p8), [#allocation2], %s1965_s18 }
  0xc5   : > { %2828 = dma.done.wait (%p3489_p2), %s366_s16, 1024  }
  0xc6   : > { %2830 = vsyncadd (%p3489_p2), %s366_s16, 4294966272  ;;  %s374_s13 = sand.u32 1, %s2941_s9   ;;  %s1966_s17 = sshll.u32 %s3190_s29, 3 }
  0xc7   : > { %s375_s15 = scalar_lea.sflag [#allocation6], %s374_s13  ;;  %s3204_s22 = scalar_lea.vmem [#allocation5], %s1966_s17 }
  0xc8   : > { %2832 = dma.done.wait (%p3489_p2), %s375_s15, 1152  }
  0xc9   : > { %2834 = vsyncadd (%p3489_p2), %s375_s15, 4294966144  ;;  %s3210_s27 = scalar_lea.vmem [#allocation7], %s1965_s18  ;;  %p3490_p9 = scmp.eq.s32.totalorder %s2941_s9, 0 }
  0xcb   : > { %2836 = dma.done.wait (%p3490_p9), [#allocation9], 4096   ;;  %p3491_p12 = pmov %p3490_p9 }
  0xcc   : > { %p3492_p1 = pmov %p3490_p9 }
  0xcd   : > { %2838 = vsyncadd (%p3491_p12), [#allocation9], 4294963200 }
  0xce   : > { %2840 = dma.done.wait (%p3492_p1), [#allocation12], 1024   ;;  %p3493_p6 = pmov %p3492_p1 }
  0xcf   : > { %v2553_v0 = vld [vmem:[#allocation8] sm:$0xff]   ;;  %v2554_v1 = vld [vmem:[#allocation8 + $0x8] sm:$0xff]   ;;  %v2555_v2 = vld [vmem:[#allocation8 + $0x10] sm:$0xff]   ;;  %vm2872_vm0 = vmmov 0   ;;  %s3494_s10 = sld [smem:[#allocation27_spill]]  ;;  %s3495_s19 = sld [smem:[#allocation24_spill]] }
  0xd0   : > { %2842 = vsyncadd (%p3493_p6), [#allocation12], 4294966272  ;;  %2170 = vmatprep.subr.bf16.mxu0 %v2553_v0  ;;  %v2556_v3 = vld [vmem:[#allocation8 + $0x18] sm:$0xff]   ;;  %v2561_v4 = vld [vmem:[%s3210_s27] sm:$0xff]   ;;  %s2034_s3 = sshll.u32 %s2941_s9, 7  ;;  %s441_s21 = scalar_lea.vmem [#allocation13], %s1966_s17 }
  0xd1   : > { %2171 = vmatpush3.bf16.msra.mxu0 %v2553_v0  ;;  %2186 = vmatprep.mubr.bf16.mxu0 %v2561_v4  ;;  %v2557_v5 = vld [vmem:[#allocation8 + $0x20] sm:$0xff]   ;;  %v2558_v6 = vld [vmem:[#allocation8 + $0x28] sm:$0xff]   ;;  %v2559_v7 = vld [vmem:[#allocation8 + $0x30] sm:$0xff]   ;;  %s1808_s18 = sshll.u32 %s441_s21, 4  ;;  %s3496_s13 = sld [smem:[#allocation28_spill]]  ;;  %s3384_s18 = int_to_ptr.vmem [resolvable:$true] %s1808_s18 }
  0xd2   : > { %2172 = vmatprep.subr.bf16.mxu0 %v2554_v1  ;;  %v2560_v8 = vld [vmem:[#allocation8 + $0x38] sm:$0xff]   ;;  %v2562_v9 = vld [vmem:[%s3210_s27 + $0x8] sm:$0xff]   ;;  %v2563_v10 = vld [vmem:[%s3210_s27 + $0x10] sm:$0xff]   ;;  %s1795_s9 = scalar_lea.sflag [#allocation4], %s3190_s29  ;;  %s2874_s17 = smov [#allocation13]  }
  0xd3   : > { %v2564_v11 = vld [vmem:[%s3210_s27 + $0x18] sm:$0xff]   ;;  %v2565_v12 = vld [vmem:[%s3210_s27 + $0x20] sm:$0xff]   ;;  %v2566_v13 = vld [vmem:[%s3210_s27 + $0x28] sm:$0xff]  }
  0xd4   : > { %v2567_v14 = vld [vmem:[%s3210_s27 + $0x30] sm:$0xff]   ;;  %v2568_v15 = vld [vmem:[%s3210_s27 + $0x38] sm:$0xff]   ;;  %v2577_v17 = vld [vmem:[#allocation10] sm:$0xff]   ;;  %s2787_s27 = sshll.u32 %s2874_s17, 4  ;;  %s2788_s27 = int_to_ptr.vmem [resolvable:$false] %s2787_s27 }
  0xd5   : > { %2173 = vmatpush3.bf16.msra.mxu0 %v2554_v1  ;;  %v3229_v16 = vld [vmem:[%s3194_s23] sm:$0xff]   ;;  %v2578_v18 = vld [vmem:[#allocation10 + $0x8] sm:$0xff]   ;;  %v2580_v20 = vld [vmem:[#allocation10 + $0x18] sm:$0xff]   ;;  %p3497_p0 = scmp.ne.s32.totalorder %s3495_s19, 0  ;;  %s2789_s11 = scalar_lea.vmem %s2788_s27, 256 }
  0xd6   : > { %2174 = vmatprep.subr.bf16.mxu0 %v2555_v2  ;;  %2218 = vmatprep.mubr.bf16.mxu1 %v3229_v16  ;;  %v2579_v19 = vld [vmem:[#allocation10 + $0x10] sm:$0xff]   ;;  %v2581_v21 = vld [vmem:[#allocation10 + $0x20] sm:$0xff]   ;;  %v3233_v46 = vld [vmem:[%s3194_s23 + $0x8] sm:$0xff]   ;;  %p2790_p13 = scmp.lt.s32.totalorder %s3384_s18, %s2788_s27 }
  0xd7   : > { %v3236_v47 = vld [vmem:[%s3194_s23 + $0x10] sm:$0xff]   ;;  %v3241_v48 = vld [vmem:[%s3194_s23 + $0x18] sm:$0xff]   ;;  %v3244_v49 = vld [vmem:[%s3194_s23 + $0x20] sm:$0xff]   ;;  %s3382_s15 = scalar_lea.hbm %s3496_s13, %s2034_s3 }
  0xd8   : > { %v3249_v50 = vld [vmem:[%s3194_s23 + $0x28] sm:$0xff]   ;;  %v3252_v51 = vld [vmem:[%s3194_s23 + $0x30] sm:$0xff]   ;;  %v3257_v52 = vld [vmem:[%s3194_s23 + $0x38] sm:$0xff]  }
  0xd9   : > { %2175 = vmatpush3.bf16.msra.mxu0 %v2555_v2  ;;  %v2582_v53 = vld [vmem:[#allocation10 + $0x28] sm:$0xff]   ;;  %v2583_v54 = vld [vmem:[#allocation10 + $0x30] sm:$0xff]   ;;  %v2584_v55 = vld [vmem:[#allocation10 + $0x38] sm:$0xff]  }
  0xda   : > { %2176 = vmatprep.subr.bf16.mxu0 %v2556_v3  ;;  %v3264_v56 = vld [vmem:[%s3431_s5] ss:$0 sm:$0xff] }
  0xdd   : > { %2177 = vmatpush3.bf16.msra.mxu0 %v2556_v3 }
  0xde   : > { %2178 = vmatprep.subr.bf16.mxu0 %v2557_v5 }
  0xe1   : > { %2179 = vmatpush3.bf16.msra.mxu0 %v2557_v5 }
  0xe2   : > { %2180 = vmatprep.subr.bf16.mxu0 %v2558_v6 }
  0xe5   : > { %2181 = vmatpush3.bf16.msra.mxu0 %v2558_v6 }
  0xe6   : > { %2182 = vmatprep.subr.bf16.mxu0 %v2559_v7 }
  0xe9   : > { %2183 = vmatpush3.bf16.msra.mxu0 %v2559_v7 }
  0xea   : > { %2184 = vmatprep.subr.bf16.mxu0 %v2560_v8 }
  0xed   : > { %2185 = vmatpush3.bf16.msra.mxu0 %v2560_v8 }
  0xee   : > { %2234 = vmatprep.subr.bf16.mxu0 %v2577_v17 }
  0xf0   : > { %2187 = vmatmul.mubr.bf16.vlgmr.msra.gmra.mrb[0].mxu0 %v2562_v9 }
  0xf1   : > { %2190 = vmatprep.mubr.bf16.mxu0 %v2563_v10  ;;  %2235 = vmatpush3.bf16.msra.mxu0 %v2577_v17 }
  0xf2   : > { %2236 = vmatprep.subr.bf16.mxu0 %v2578_v18 }
  0xf5   : > { %2237 = vmatpush3.bf16.msra.mxu0 %v2578_v18 }
  0xf6   : > { %2238 = vmatprep.subr.bf16.mxu0 %v2579_v19 }
  0xf8   : > { %2191 = vmatmul.mubr.bf16.gmra.mrb[4].mxu0 %v2564_v11 }
  0xf9   : > { %2194 = vmatprep.mubr.bf16.mxu0 %v2565_v12  ;;  %2239 = vmatpush3.bf16.msra.mxu0 %v2579_v19 }
  0xfa   : > { %2240 = vmatprep.subr.bf16.mxu0 %v2580_v20 }
  0xfd   : > { %2241 = vmatpush3.bf16.msra.mxu0 %v2580_v20 }
  0xfe   : > { %2242 = vmatprep.subr.bf16.mxu0 %v2581_v21 }
 0x100   : > { %2195 = vmatmul.mubr.bf16.gmra.mrb[8].mxu0 %v2566_v13 }
 0x101   : > { %2198 = vmatprep.mubr.bf16.mxu0 %v2567_v14  ;;  %2243 = vmatpush3.bf16.msra.mxu0 %v2581_v21 }
 0x102   : > { %2244 = vmatprep.subr.bf16.mxu0 %v2582_v53 }
 0x105   : > { %2245 = vmatpush3.bf16.msra.mxu0 %v2582_v53 }
 0x106   : > { %2246 = vmatprep.subr.bf16.mxu0 %v2583_v54 }
 0x108   : > { %2199 = vmatmul.mubr.bf16.gmra.mrb[12].mxu0 %v2568_v15 }
 0x109   : > { %2247 = vmatpush3.bf16.msra.mxu0 %v2583_v54 }
 0x10a   : > { %2248 = vmatprep.subr.bf16.mxu0 %v2584_v55 }
 0x10d   : > { %2249 = vmatpush3.bf16.msra.mxu0 %v2584_v55 }
 0x1c3   : > { %v2188_v22 = vpop.f32.mrb[0].mxu0 }
 0x1c4   : > { %v622_v23 = vpop.f32.mrb[1].mxu0 }
 0x1c5   : > { %v2189_v24 = vpop.f32.mrb[2].mxu0 }
 0x1c6   : > { %v686_v25 = vpack.c.bf16 %v2189_v24, %v2188_v22  ;;  %v625_v26 = vpop.f32.mrb[3].mxu0 }
 0x1c7   : > { %v685_v27 = vpack.c.bf16 %v625_v26, %v622_v23 }
 0x1c9   : > { %2202 = vmatprep.subr.bf16.mxu1 %v685_v27 }
 0x1ca   : > { %2203 = vmatpush3.bf16.msra.mxu1 %v685_v27 }
 0x1cb   : > { %v2192_v28 = vpop.f32.mrb[4].mxu0  ;;  %2204 = vmatprep.subr.bf16.mxu1 %v686_v25 }
 0x1cc   : > { %v638_v29 = vpop.f32.mrb[5].mxu0 }
 0x1cd   : > { %v2193_v30 = vpop.f32.mrb[6].mxu0 }
 0x1ce   : > { %v688_v31 = vpack.c.bf16 %v2193_v30, %v2192_v28  ;;  %v641_v32 = vpop.f32.mrb[7].mxu0  ;;  %2205 = vmatpush3.bf16.msra.mxu1 %v686_v25 }
 0x1cf   : > { %v687_v33 = vpack.c.bf16 %v641_v32, %v638_v29 }
 0x1d1   : > { %2206 = vmatprep.subr.bf16.mxu1 %v687_v33 }
 0x1d2   : > { %2207 = vmatpush3.bf16.msra.mxu1 %v687_v33 }
 0x1d3   : > { %v2196_v34 = vpop.f32.mrb[8].mxu0  ;;  %2208 = vmatprep.subr.bf16.mxu1 %v688_v31 }
 0x1d4   : > { %v654_v35 = vpop.f32.mrb[9].mxu0 }
 0x1d5   : > { %v2197_v36 = vpop.f32.mrb[10].mxu0 }
 0x1d6   : > { %v690_v37 = vpack.c.bf16 %v2197_v36, %v2196_v34  ;;  %v657_v38 = vpop.f32.mrb[11].mxu0  ;;  %2209 = vmatpush3.bf16.msra.mxu1 %v688_v31 }
 0x1d7   : > { %v689_v39 = vpack.c.bf16 %v657_v38, %v654_v35 }
 0x1d9   : > { %2210 = vmatprep.subr.bf16.mxu1 %v689_v39 }
 0x1da   : > { %2211 = vmatpush3.bf16.msra.mxu1 %v689_v39 }
 0x1db   : > { %v2200_v40 = vpop.f32.mrb[12].mxu0  ;;  %2212 = vmatprep.subr.bf16.mxu1 %v690_v37 }
 0x1dc   : > { %v670_v41 = vpop.f32.mrb[13].mxu0 }
 0x1dd   : > { %v2201_v42 = vpop.f32.mrb[14].mxu0 }
 0x1de   : > { %v692_v43 = vpack.c.bf16 %v2201_v42, %v2200_v40  ;;  %v673_v44 = vpop.f32.mrb[15].mxu0  ;;  %2213 = vmatpush3.bf16.msra.mxu1 %v690_v37 }
 0x1df   : > { %v691_v45 = vpack.c.bf16 %v673_v44, %v670_v41 }
 0x1e1   : > { %2214 = vmatprep.subr.bf16.mxu1 %v691_v45 }
 0x1e2   : > { %2215 = vmatpush3.bf16.msra.mxu1 %v691_v45 }
 0x1e3   : > { %2216 = vmatprep.subr.bf16.mxu1 %v692_v43 }
 0x1e6   : > { %2217 = vmatpush3.bf16.msra.mxu1 %v692_v43 }
 0x1e9   : > { %2219 = vmatmul.mubr.bf16.vlgmr.msra.gmra.mrb[0].mxu1 %v3233_v46 }
 0x1ea   : > { %2222 = vmatprep.mubr.bf16.mxu1 %v3236_v47 }
 0x1f1   : > { %2223 = vmatmul.mubr.bf16.gmra.mrb[4].mxu1 %v3241_v48 }
 0x1f2   : > { %2226 = vmatprep.mubr.bf16.mxu1 %v3244_v49 }
 0x1f9   : > { %2227 = vmatmul.mubr.bf16.gmra.mrb[8].mxu1 %v3249_v50 }
 0x1fa   : > { %2230 = vmatprep.mubr.bf16.mxu1 %v3252_v51 }
 0x201   : > { %2231 = vmatmul.mubr.bf16.gmra.mrb[12].mxu1 %v3257_v52 }
 0x202   : > { %2282 = vmatprep.mubr.bf16.mxu1 %v3229_v16 }
 0x2bc   : > { %v2220_v57 = vpop.f32.mrb[0].mxu1 }
 0x2bd   : > { %v788_v58 = vadd.f32 %v2220_v57, %v3264_v56  ;;  %v779_v59 = vpop.f32.mrb[1].mxu1 }
 0x2be   : > { %v780_v60 = vadd.f32 %v3264_v56, %v779_v59  ;;  %v2221_v61 = vpop.f32.mrb[2].mxu1 }
 0x2bf   : > { %v844_v62 = vmul.f32 0.1, %v788_v58  ;;  %v791_v63 = vadd.f32 %v2221_v61, %v3264_v56  ;;  %v782_v0 = vpop.f32.mrb[3].mxu1 }
 0x2c0   : > { %v842_v1 = vmul.f32 0.1, %v780_v60  ;;  %v783_v2 = vadd.f32 %v3264_v56, %v782_v0 }
 0x2c1   : > { %v845_v3 = vmul.f32 0.1, %v791_v63  ;;  %v860_v5 = vmax.f32 %v788_v58, %v844_v62 }
 0x2c2   : > { %v843_v4 = vmul.f32 0.1, %v783_v2  ;;  %v858_v7 = vmax.f32 %v780_v60, %v842_v1 }
 0x2c3   : > { %v861_v6 = vmax.f32 %v791_v63, %v845_v3 }
 0x2c4   : > { %v859_v8 = vmax.f32 %v783_v2, %v843_v4  ;;  %v2224_v9 = vpop.f32.mrb[4].mxu1 }
 0x2c5   : > { %v875_v10 = vpack.c.bf16 %v861_v6, %v860_v5  ;;  %v804_v11 = vadd.f32 %v2224_v9, %v3264_v56  ;;  %v795_v12 = vpop.f32.mrb[5].mxu1 }
 0x2c6   : > { %v796_v13 = vadd.f32 %v3264_v56, %v795_v12  ;;  %v2225_v14 = vpop.f32.mrb[6].mxu1  ;;  %v874_v15 = vpack.c.bf16 %v859_v8, %v858_v7  ;;  %v2587_v12 = vld [vmem:[#allocation10 + $0x50] sm:$0xff]  }
 0x2c7   : > { %v848_v17 = vmul.f32 0.1, %v804_v11  ;;  %v807_v18 = vadd.f32 %v2225_v14, %v3264_v56  ;;  %v798_v19 = vpop.f32.mrb[7].mxu1 }
 0x2c8   : > { %v846_v20 = vmul.f32 0.1, %v796_v13  ;;  %v799_v21 = vadd.f32 %v3264_v56, %v798_v19  ;;  %2250 = vmatprep.mubr.bf16.mxu0 %v874_v15 }
 0x2c9   : > { %v849_v22 = vmul.f32 0.1, %v807_v18  ;;  %2251 = vmatmul.mubr.bf16.vlgmr.msra.gmra.mrb[16].mxu0 %v875_v10  ;;  %v864_v24 = vmax.f32 %v804_v11, %v848_v17  ;;  %v2585_v10 = vld [vmem:[#allocation10 + $0x40] sm:$0xff]   ;;  %v2586_v11 = vld [vmem:[#allocation10 + $0x48] sm:$0xff]  }
 0x2ca   : > { %v847_v23 = vmul.f32 0.1, %v799_v21  ;;  %v862_v26 = vmax.f32 %v796_v13, %v846_v20  ;;  %2298 = vmatprep.subr.bf16.mxu0 %v2585_v10  ;;  %v2589_v13 = vld [vmem:[#allocation10 + $0x60] sm:$0xff]  }
 0x2cb   : > { %v865_v25 = vmax.f32 %v807_v18, %v849_v22  ;;  %2299 = vmatpush3.bf16.msra.mxu0 %v2585_v10 }
 0x2cc   : > { %v863_v27 = vmax.f32 %v799_v21, %v847_v23  ;;  %v2228_v28 = vpop.f32.mrb[8].mxu1  ;;  %2300 = vmatprep.subr.bf16.mxu0 %v2586_v11 }
 0x2cd   : > { %v820_v29 = vadd.f32 %v2228_v28, %v3264_v56  ;;  %v811_v30 = vpop.f32.mrb[9].mxu1  ;;  %v877_v31 = vpack.c.bf16 %v865_v25, %v864_v24 }
 0x2ce   : > { %v812_v32 = vadd.f32 %v3264_v56, %v811_v30  ;;  %v2229_v33 = vpop.f32.mrb[10].mxu1  ;;  %v876_v34 = vpack.c.bf16 %v863_v27, %v862_v26 }
 0x2cf   : > { %v852_v35 = vmul.f32 0.1, %v820_v29  ;;  %v823_v36 = vadd.f32 %v2229_v33, %v3264_v56  ;;  %v814_v37 = vpop.f32.mrb[11].mxu1  ;;  %2301 = vmatpush3.bf16.msra.mxu0 %v2586_v11 }
 0x2d0   : > { %v850_v38 = vmul.f32 0.1, %v812_v32  ;;  %v815_v39 = vadd.f32 %v3264_v56, %v814_v37  ;;  %2254 = vmatprep.mubr.bf16.mxu0 %v876_v34  ;;  %2302 = vmatprep.subr.bf16.mxu0 %v2587_v12 }
 0x2d1   : > { %v853_v40 = vmul.f32 0.1, %v823_v36  ;;  %2255 = vmatmul.mubr.bf16.gmra.mrb[20].mxu0 %v877_v31  ;;  %v868_v42 = vmax.f32 %v820_v29, %v852_v35 }
 0x2d2   : > { %v851_v41 = vmul.f32 0.1, %v815_v39  ;;  %v866_v44 = vmax.f32 %v812_v32, %v850_v38 }
 0x2d3   : > { %v869_v43 = vmax.f32 %v823_v36, %v853_v40  ;;  %2303 = vmatpush3.bf16.msra.mxu0 %v2587_v12  ;;  %v2591_v40 = vld [vmem:[#allocation10 + $0x70] sm:$0xff]  }
 0x2d4   : > { %v867_v45 = vmax.f32 %v815_v39, %v851_v41  ;;  %v2232_v53 = vpop.f32.mrb[12].mxu1  ;;  %v2590_v39 = vld [vmem:[#allocation10 + $0x68] sm:$0xff]   ;;  %v2592_v41 = vld [vmem:[#allocation10 + $0x78] sm:$0xff]  }
 0x2d5   : > { %v836_v54 = vadd.f32 %v2232_v53, %v3264_v56  ;;  %v827_v55 = vpop.f32.mrb[13].mxu1  ;;  %v879_v57 = vpack.c.bf16 %v869_v43, %v868_v42  ;;  %v3293_v42 = vld [vmem:[%s3431_s5 + $0x1] ss:$0 sm:$0xff] }
 0x2d6   : > { %v828_v58 = vadd.f32 %v3264_v56, %v827_v55  ;;  %v2233_v59 = vpop.f32.mrb[14].mxu1  ;;  %v878_v60 = vpack.c.bf16 %v867_v45, %v866_v44 }
 0x2d7   : > { %v856_v61 = vmul.f32 0.1, %v836_v54  ;;  %v839_v62 = vadd.f32 %v2233_v59, %v3264_v56  ;;  %v830_v63 = vpop.f32.mrb[15].mxu1 }
 0x2d8   : > { %v854_v0 = vmul.f32 0.1, %v828_v58  ;;  %v831_v1 = vadd.f32 %v3264_v56, %v830_v63  ;;  %2258 = vmatprep.mubr.bf16.mxu0 %v878_v60  ;;  %v2588_v56 = vld [vmem:[#allocation10 + $0x58] sm:$0xff]  }
 0x2d9   : > { %v857_v2 = vmul.f32 0.1, %v839_v62  ;;  %2259 = vmatmul.mubr.bf16.gmra.mrb[24].mxu0 %v879_v57  ;;  %v872_v4 = vmax.f32 %v836_v54, %v856_v61  ;;  %2304 = vmatprep.subr.bf16.mxu0 %v2588_v56 }
 0x2da   : > { %v855_v3 = vmul.f32 0.1, %v831_v1  ;;  %v870_v6 = vmax.f32 %v828_v58, %v854_v0  ;;  %2305 = vmatpush3.bf16.msra.mxu0 %v2588_v56 }
 0x2db   : > { %v873_v5 = vmax.f32 %v839_v62, %v857_v2  ;;  %2306 = vmatprep.subr.bf16.mxu0 %v2589_v13 }
 0x2dc   : > { %v871_v7 = vmax.f32 %v831_v1, %v855_v3 }
 0x2dd   : > { %v881_v8 = vpack.c.bf16 %v873_v5, %v872_v4 }
 0x2de   : > { %v880_v9 = vpack.c.bf16 %v871_v7, %v870_v6  ;;  %2307 = vmatpush3.bf16.msra.mxu0 %v2589_v13 }
 0x2df   : > { %2308 = vmatprep.subr.bf16.mxu0 %v2590_v39 }
 0x2e0   : > { %2262 = vmatprep.mubr.bf16.mxu0 %v880_v9 }
 0x2e1   : > { %2263 = vmatmul.mubr.bf16.gmra.mrb[28].mxu0 %v881_v8 }
 0x2e2   : > { %2309 = vmatpush3.bf16.msra.mxu0 %v2590_v39 }
 0x2e3   : > { %2310 = vmatprep.subr.bf16.mxu0 %v2591_v40 }
 0x2e6   : > { %2311 = vmatpush3.bf16.msra.mxu0 %v2591_v40 }
 0x2e7   : > { %2312 = vmatprep.subr.bf16.mxu0 %v2592_v41 }
 0x2ea   : > { %2313 = vmatpush3.bf16.msra.mxu0 %v2592_v41 }
 0x39c   : > { %v2252_v14 = vpop.f32.mrb[16].mxu0 }
 0x39d   : > { %v981_v15 = vpop.f32.mrb[17].mxu0 }
 0x39e   : > { %v2253_v17 = vpop.f32.mrb[18].mxu0 }
 0x39f   : > { %v1045_v18 = vpack.c.bf16 %v2253_v17, %v2252_v14  ;;  %v984_v19 = vpop.f32.mrb[19].mxu0 }
 0x3a0   : > { %v1044_v20 = vpack.c.bf16 %v984_v19, %v981_v15 }
 0x3a2   : > { %2266 = vmatprep.subr.bf16.mxu1 %v1044_v20 }
 0x3a3   : > { %2267 = vmatpush3.bf16.msra.mxu1 %v1044_v20 }
 0x3a4   : > { %v2256_v21 = vpop.f32.mrb[20].mxu0  ;;  %2268 = vmatprep.subr.bf16.mxu1 %v1045_v18 }
 0x3a5   : > { %v997_v22 = vpop.f32.mrb[21].mxu0 }
 0x3a6   : > { %v2257_v23 = vpop.f32.mrb[22].mxu0 }
 0x3a7   : > { %v1047_v24 = vpack.c.bf16 %v2257_v23, %v2256_v21  ;;  %v1000_v25 = vpop.f32.mrb[23].mxu0  ;;  %2269 = vmatpush3.bf16.msra.mxu1 %v1045_v18 }
 0x3a8   : > { %v1046_v26 = vpack.c.bf16 %v1000_v25, %v997_v22 }
 0x3aa   : > { %2270 = vmatprep.subr.bf16.mxu1 %v1046_v26 }
 0x3ab   : > { %2271 = vmatpush3.bf16.msra.mxu1 %v1046_v26 }
 0x3ac   : > { %v2260_v27 = vpop.f32.mrb[24].mxu0  ;;  %2272 = vmatprep.subr.bf16.mxu1 %v1047_v24 }
 0x3ad   : > { %v1013_v28 = vpop.f32.mrb[25].mxu0 }
 0x3ae   : > { %v2261_v29 = vpop.f32.mrb[26].mxu0 }
 0x3af   : > { %v1049_v30 = vpack.c.bf16 %v2261_v29, %v2260_v27  ;;  %v1016_v31 = vpop.f32.mrb[27].mxu0  ;;  %2273 = vmatpush3.bf16.msra.mxu1 %v1047_v24 }
 0x3b0   : > { %v1048_v32 = vpack.c.bf16 %v1016_v31, %v1013_v28 }
 0x3b2   : > { %2274 = vmatprep.subr.bf16.mxu1 %v1048_v32 }
 0x3b3   : > { %2275 = vmatpush3.bf16.msra.mxu1 %v1048_v32 }
 0x3b4   : > { %v2264_v33 = vpop.f32.mrb[28].mxu0  ;;  %2276 = vmatprep.subr.bf16.mxu1 %v1049_v30 }
 0x3b5   : > { %v1029_v34 = vpop.f32.mrb[29].mxu0 }
 0x3b6   : > { %v2265_v35 = vpop.f32.mrb[30].mxu0 }
 0x3b7   : > { %v1051_v36 = vpack.c.bf16 %v2265_v35, %v2264_v33  ;;  %v1032_v37 = vpop.f32.mrb[31].mxu0  ;;  %2277 = vmatpush3.bf16.msra.mxu1 %v1049_v30 }
 0x3b8   : > { %v1050_v38 = vpack.c.bf16 %v1032_v37, %v1029_v34 }
 0x3ba   : > { %2278 = vmatprep.subr.bf16.mxu1 %v1050_v38 }
 0x3bb   : > { %2279 = vmatpush3.bf16.msra.mxu1 %v1050_v38 }
 0x3bc   : > { %2280 = vmatprep.subr.bf16.mxu1 %v1051_v36 }
 0x3bf   : > { %2281 = vmatpush3.bf16.msra.mxu1 %v1051_v36 }
 0x3c2   : > { %2283 = vmatmul.mubr.bf16.vlgmr.msra.gmra.mrb[16].mxu1 %v3233_v46 }
 0x3c3   : > { %2286 = vmatprep.mubr.bf16.mxu1 %v3236_v47 }
 0x3ca   : > { %2287 = vmatmul.mubr.bf16.gmra.mrb[20].mxu1 %v3241_v48 }
 0x3cb   : > { %2290 = vmatprep.mubr.bf16.mxu1 %v3244_v49 }
 0x3d2   : > { %2291 = vmatmul.mubr.bf16.gmra.mrb[24].mxu1 %v3249_v50 }
 0x3d3   : > { %2294 = vmatprep.mubr.bf16.mxu1 %v3252_v51 }
 0x3da   : > { %2295 = vmatmul.mubr.bf16.gmra.mrb[28].mxu1 %v3257_v52 }
 0x3db   : > { %2346 = vmatprep.mubr.bf16.mxu1 %v3229_v16 }
 0x495   : > { %v2284_v43 = vpop.f32.mrb[16].mxu1 }
 0x496   : > { %v1099_v44 = vadd.f32 %v2284_v43, %v3293_v42  ;;  %v1090_v45 = vpop.f32.mrb[17].mxu1 }
 0x497   : > { %v1091_v16 = vadd.f32 %v3293_v42, %v1090_v45  ;;  %v2285_v53 = vpop.f32.mrb[18].mxu1 }
 0x498   : > { %v1155_v54 = vmul.f32 0.1, %v1099_v44  ;;  %v1102_v55 = vadd.f32 %v2285_v53, %v3293_v42  ;;  %v1093_v57 = vpop.f32.mrb[19].mxu1 }
 0x499   : > { %v1153_v58 = vmul.f32 0.1, %v1091_v16  ;;  %v1094_v59 = vadd.f32 %v3293_v42, %v1093_v57 }
 0x49a   : > { %v1156_v60 = vmul.f32 0.1, %v1102_v55  ;;  %v1171_v62 = vmax.f32 %v1099_v44, %v1155_v54 }
 0x49b   : > { %v1154_v61 = vmul.f32 0.1, %v1094_v59  ;;  %v1169_v0 = vmax.f32 %v1091_v16, %v1153_v58 }
 0x49c   : > { %v1172_v63 = vmax.f32 %v1102_v55, %v1156_v60 }
 0x49d   : > { %v1170_v1 = vmax.f32 %v1094_v59, %v1154_v61  ;;  %v2288_v2 = vpop.f32.mrb[20].mxu1 }
 0x49e   : > { %v1186_v3 = vpack.c.bf16 %v1172_v63, %v1171_v62  ;;  %v1115_v4 = vadd.f32 %v2288_v2, %v3293_v42  ;;  %v1106_v5 = vpop.f32.mrb[21].mxu1 }
 0x49f   : > { %v1107_v6 = vadd.f32 %v3293_v42, %v1106_v5  ;;  %v2289_v7 = vpop.f32.mrb[22].mxu1  ;;  %v1185_v8 = vpack.c.bf16 %v1170_v1, %v1169_v0 }
 0x4a0   : > { %v1159_v9 = vmul.f32 0.1, %v1115_v4  ;;  %v1118_v10 = vadd.f32 %v2289_v7, %v3293_v42  ;;  %v1109_v11 = vpop.f32.mrb[23].mxu1 }
 0x4a1   : > { %v1157_v12 = vmul.f32 0.1, %v1107_v6  ;;  %v1110_v56 = vadd.f32 %v3293_v42, %v1109_v11  ;;  %2314 = vmatprep.mubr.bf16.mxu0 %v1185_v8 }
 0x4a2   : > { %v1160_v13 = vmul.f32 0.1, %v1118_v10  ;;  %2315 = vmatmul.mubr.bf16.vlgmr.msra.gmra.mrb[32].mxu0 %v1186_v3  ;;  %v1175_v15 = vmax.f32 %v1115_v4, %v1159_v9 }
 0x4a3   : > { %v1158_v14 = vmul.f32 0.1, %v1110_v56  ;;  %v1173_v18 = vmax.f32 %v1107_v6, %v1157_v12 }
 0x4a4   : > { %v1176_v17 = vmax.f32 %v1118_v10, %v1160_v13 }
 0x4a5   : > { %v1174_v19 = vmax.f32 %v1110_v56, %v1158_v14  ;;  %v2292_v20 = vpop.f32.mrb[24].mxu1 }
 0x4a6   : > { %v1131_v21 = vadd.f32 %v2292_v20, %v3293_v42  ;;  %v1122_v22 = vpop.f32.mrb[25].mxu1  ;;  %v1188_v23 = vpack.c.bf16 %v1176_v17, %v1175_v15 }
 0x4a7   : > { %v1123_v24 = vadd.f32 %v3293_v42, %v1122_v22  ;;  %v2293_v25 = vpop.f32.mrb[26].mxu1  ;;  %v1187_v26 = vpack.c.bf16 %v1174_v19, %v1173_v18 }
 0x4a8   : > { %v1163_v27 = vmul.f32 0.1, %v1131_v21  ;;  %v1134_v28 = vadd.f32 %v2293_v25, %v3293_v42  ;;  %v1125_v29 = vpop.f32.mrb[27].mxu1  ;;  %v2871_v25 = vmov 0.0|0.0  }
 0x4a9   : > { %v1161_v30 = vmul.f32 0.1, %v1123_v24  ;;  %v1126_v31 = vadd.f32 %v3293_v42, %v1125_v29  ;;  %2318 = vmatprep.mubr.bf16.mxu0 %v1187_v26  ;;  %2437 = vmatprep.subr.bf16.mxu0 %v2871_v25  ;;  %v2873_v26 = vmov 0.0  }
 0x4aa   : > { %v1164_v32 = vmul.f32 0.1, %v1134_v28  ;;  %2319 = vmatmul.mubr.bf16.gmra.mrb[36].mxu0 %v1188_v23  ;;  %v1179_v34 = vmax.f32 %v1131_v21, %v1163_v27  ;;  %v3334_v27 = vld [vmem:[%s3431_s5 + $0x2] ss:$0 sm:$0xff] }
 0x4ab   : > { %v1162_v33 = vmul.f32 0.1, %v1126_v31  ;;  %v1177_v36 = vmax.f32 %v1123_v24, %v1161_v30 }
 0x4ac   : > { %v1180_v35 = vmax.f32 %v1134_v28, %v1164_v32 }
 0x4ad   : > { %v1178_v37 = vmax.f32 %v1126_v31, %v1162_v33  ;;  %v2296_v38 = vpop.f32.mrb[28].mxu1 }
 0x4ae   : > { %v1147_v39 = vadd.f32 %v2296_v38, %v3293_v42  ;;  %v1138_v40 = vpop.f32.mrb[29].mxu1  ;;  %v1190_v41 = vpack.c.bf16 %v1180_v35, %v1179_v34 }
 0x4af   : > { %v1139_v43 = vadd.f32 %v3293_v42, %v1138_v40  ;;  %v2297_v44 = vpop.f32.mrb[30].mxu1  ;;  %v1189_v45 = vpack.c.bf16 %v1178_v37, %v1177_v36 }
 0x4b0   : > { %v1167_v16 = vmul.f32 0.1, %v1147_v39  ;;  %v1150_v53 = vadd.f32 %v2297_v44, %v3293_v42  ;;  %v1141_v54 = vpop.f32.mrb[31].mxu1 }
 0x4b1   : > { %v1165_v55 = vmul.f32 0.1, %v1139_v43  ;;  %v1142_v57 = vadd.f32 %v3293_v42, %v1141_v54  ;;  %2322 = vmatprep.mubr.bf16.mxu0 %v1189_v45 }
 0x4b2   : > { %v1168_v58 = vmul.f32 0.1, %v1150_v53  ;;  %2323 = vmatmul.mubr.bf16.gmra.mrb[40].mxu0 %v1190_v41  ;;  %v1183_v60 = vmax.f32 %v1147_v39, %v1167_v16 }
 0x4b3   : > { %v1166_v59 = vmul.f32 0.1, %v1142_v57  ;;  %v1181_v62 = vmax.f32 %v1139_v43, %v1165_v55 }
 0x4b4   : > { %v1184_v61 = vmax.f32 %v1150_v53, %v1168_v58 }
 0x4b5   : > { %v1182_v63 = vmax.f32 %v1142_v57, %v1166_v59 }
 0x4b6   : > { %v1192_v0 = vpack.c.bf16 %v1184_v61, %v1183_v60 }
 0x4b7   : > { %v1191_v1 = vpack.c.bf16 %v1182_v63, %v1181_v62 }
 0x4b9   : > { %2326 = vmatprep.mubr.bf16.mxu0 %v1191_v1 }
 0x4ba   : > { %2327 = vmatmul.mubr.bf16.gmra.mrb[44].mxu0 %v1192_v0 }
 0x4bb   : > { %2394 = vmatprep.mubr.msk.f32.mxu0 %vm2872_vm0, %v2873_v26 }
 0x575   : > { %v2316_v2 = vpop.f32.mrb[32].mxu0 }
 0x576   : > { %v1293_v3 = vpop.f32.mrb[33].mxu0 }
 0x577   : > { %v2317_v4 = vpop.f32.mrb[34].mxu0 }
 0x578   : > { %v1357_v5 = vpack.c.bf16 %v2317_v4, %v2316_v2  ;;  %v1296_v6 = vpop.f32.mrb[35].mxu0 }
 0x579   : > { %v1356_v7 = vpack.c.bf16 %v1296_v6, %v1293_v3 }
 0x57b   : > { %2330 = vmatprep.subr.bf16.mxu1 %v1356_v7 }
 0x57c   : > { %2331 = vmatpush3.bf16.msra.mxu1 %v1356_v7 }
 0x57d   : > { %v2320_v42 = vpop.f32.mrb[36].mxu0  ;;  %2332 = vmatprep.subr.bf16.mxu1 %v1357_v5 }
 0x57e   : > { %v1309_v8 = vpop.f32.mrb[37].mxu0 }
 0x57f   : > { %v2321_v9 = vpop.f32.mrb[38].mxu0 }
 0x580   : > { %v1359_v10 = vpack.c.bf16 %v2321_v9, %v2320_v42  ;;  %v1312_v11 = vpop.f32.mrb[39].mxu0  ;;  %2333 = vmatpush3.bf16.msra.mxu1 %v1357_v5 }
 0x581   : > { %v1358_v12 = vpack.c.bf16 %v1312_v11, %v1309_v8 }
 0x583   : > { %2334 = vmatprep.subr.bf16.mxu1 %v1358_v12 }
 0x584   : > { %2335 = vmatpush3.bf16.msra.mxu1 %v1358_v12 }
 0x585   : > { %v2324_v56 = vpop.f32.mrb[40].mxu0  ;;  %2336 = vmatprep.subr.bf16.mxu1 %v1359_v10 }
 0x586   : > { %v1325_v13 = vpop.f32.mrb[41].mxu0 }
 0x587   : > { %v2325_v14 = vpop.f32.mrb[42].mxu0 }
 0x588   : > { %v1361_v15 = vpack.c.bf16 %v2325_v14, %v2324_v56  ;;  %v1328_v17 = vpop.f32.mrb[43].mxu0  ;;  %2337 = vmatpush3.bf16.msra.mxu1 %v1359_v10 }
 0x589   : > { %v1360_v18 = vpack.c.bf16 %v1328_v17, %v1325_v13 }
 0x58b   : > { %2338 = vmatprep.subr.bf16.mxu1 %v1360_v18 }
 0x58c   : > { %2339 = vmatpush3.bf16.msra.mxu1 %v1360_v18 }
 0x58d   : > { %v2328_v19 = vpop.f32.mrb[44].mxu0  ;;  %2340 = vmatprep.subr.bf16.mxu1 %v1361_v15 }
 0x58e   : > { %v1341_v20 = vpop.f32.mrb[45].mxu0 }
 0x58f   : > { %v2329_v21 = vpop.f32.mrb[46].mxu0 }
 0x590   : > { %v1363_v22 = vpack.c.bf16 %v2329_v21, %v2328_v19  ;;  %v1344_v23 = vpop.f32.mrb[47].mxu0  ;;  %2341 = vmatpush3.bf16.msra.mxu1 %v1361_v15 }
 0x591   : > { %v1362_v24 = vpack.c.bf16 %v1344_v23, %v1341_v20 }
 0x593   : > { %2342 = vmatprep.subr.bf16.mxu1 %v1362_v24 }
 0x594   : > { %2343 = vmatpush3.bf16.msra.mxu1 %v1362_v24 }
 0x595   : > { %2344 = vmatprep.subr.bf16.mxu1 %v1363_v22 }
 0x598   : > { %2345 = vmatpush3.bf16.msra.mxu1 %v1363_v22 }
 0x599   : > { %2397 = vmatprep.subr.bf16.mxu1 %v2873_v26 }
 0x59b   : > { %2347 = vmatmul.mubr.bf16.vlgmr.msra.gmra.mrb[32].mxu1 %v3233_v46  ;;  %v2593_v46 = vld [vmem:[#allocation10 + $0x80] sm:$0xff]  }
 0x59c   : > { %2350 = vmatprep.mubr.bf16.mxu1 %v3236_v47  ;;  %2398 = vmatpush3.bf16.msra.mxu1 %v2593_v46  ;;  %v2594_v47 = vld [vmem:[#allocation10 + $0x88] sm:$0xff]  }
 0x59d   : > { %2399 = vmatprep.subr.bf16.mxu1 %v2873_v26 }
 0x5a0   : > { %2400 = vmatpush3.bf16.msra.mxu1 %v2594_v47 }
 0x5a1   : > { %2401 = vmatprep.subr.bf16.mxu1 %v2873_v26 }
 0x5a3   : > { %2351 = vmatmul.mubr.bf16.gmra.mrb[36].mxu1 %v3241_v48  ;;  %v2595_v48 = vld [vmem:[#allocation10 + $0x90] sm:$0xff]  }
 0x5a4   : > { %2354 = vmatprep.mubr.bf16.mxu1 %v3244_v49  ;;  %2402 = vmatpush3.bf16.msra.mxu1 %v2595_v48  ;;  %v2596_v49 = vld [vmem:[#allocation10 + $0x98] sm:$0xff]  }
 0x5a5   : > { %2403 = vmatprep.subr.bf16.mxu1 %v2873_v26 }
 0x5a8   : > { %2404 = vmatpush3.bf16.msra.mxu1 %v2596_v49 }
 0x5a9   : > { %2405 = vmatprep.subr.bf16.mxu1 %v2873_v26 }
 0x5ab   : > { %2355 = vmatmul.mubr.bf16.gmra.mrb[40].mxu1 %v3249_v50  ;;  %v2597_v50 = vld [vmem:[#allocation10 + $0xa0] sm:$0xff]  }
 0x5ac   : > { %2358 = vmatprep.mubr.bf16.mxu1 %v3252_v51  ;;  %2406 = vmatpush3.bf16.msra.mxu1 %v2597_v50  ;;  %v2598_v51 = vld [vmem:[#allocation10 + $0xa8] sm:$0xff]  }
 0x5ad   : > { %2407 = vmatprep.subr.bf16.mxu1 %v2873_v26 }
 0x5b0   : > { %2408 = vmatpush3.bf16.msra.mxu1 %v2598_v51 }
 0x5b1   : > { %2409 = vmatprep.subr.bf16.mxu1 %v2873_v26 }
 0x5b3   : > { %2359 = vmatmul.mubr.bf16.gmra.mrb[44].mxu1 %v3257_v52  ;;  %v2599_v52 = vld [vmem:[#allocation10 + $0xb0] sm:$0xff]  }
 0x5b4   : > { %2413 = vmatprep.mubr.msk.bf16.mxu1 %vm2872_vm0, %v2873_v26  ;;  %2410 = vmatpush3.bf16.msra.mxu1 %v2599_v52 }
 0x5b5   : > { %2411 = vmatprep.subr.bf16.mxu1 %v2873_v26 }
 0x66e   : > { %v2348_v28 = vpop.f32.mrb[32].mxu1 }
 0x66f   : > { %v1411_v29 = vadd.f32 %v2348_v28, %v3334_v27  ;;  %v1402_v30 = vpop.f32.mrb[33].mxu1 }
 0x670   : > { %v1403_v31 = vadd.f32 %v3334_v27, %v1402_v30  ;;  %v2349_v32 = vpop.f32.mrb[34].mxu1 }
 0x671   : > { %v1467_v33 = vmul.f32 0.1, %v1411_v29  ;;  %v1414_v34 = vadd.f32 %v2349_v32, %v3334_v27  ;;  %v1405_v35 = vpop.f32.mrb[35].mxu1 }
 0x672   : > { %v1465_v36 = vmul.f32 0.1, %v1403_v31  ;;  %v1406_v37 = vadd.f32 %v3334_v27, %v1405_v35 }
 0x673   : > { %v1468_v38 = vmul.f32 0.1, %v1414_v34  ;;  %v1483_v40 = vmax.f32 %v1411_v29, %v1467_v33 }
 0x674   : > { %v1466_v39 = vmul.f32 0.1, %v1406_v37  ;;  %v1481_v43 = vmax.f32 %v1403_v31, %v1465_v36 }
 0x675   : > { %v1484_v41 = vmax.f32 %v1414_v34, %v1468_v38 }
 0x676   : > { %v1482_v44 = vmax.f32 %v1406_v37, %v1466_v39  ;;  %v2352_v45 = vpop.f32.mrb[36].mxu1  ;;  %v2600_v39 = vld [vmem:[#allocation10 + $0xb8] sm:$0xff]  }
 0x677   : > { %v2441_v16 = vpack.c.bf16 %v1484_v41, %v1483_v40  ;;  %v1427_v53 = vadd.f32 %v2352_v45, %v3334_v27  ;;  %v1418_v54 = vpop.f32.mrb[37].mxu1  ;;  %2412 = vmatpush3.bf16.msra.mxu1 %v2600_v39  ;;  %v2601_v40 = vld [vmem:[#allocation11] sm:$0xff]   ;;  %v2602_v41 = vld [vmem:[#allocation11 + $0x8] sm:$0xff]  }
 0x678   : > { %v2438_v55 = vpack.c.bf16 %v1482_v44, %v1481_v43  ;;  %v1419_v57 = vadd.f32 %v3334_v27, %v1418_v54  ;;  %v2353_v58 = vpop.f32.mrb[38].mxu1  ;;  %v2603_v43 = vld [vmem:[#allocation11 + $0x10] sm:$0xff]   ;;  %v2605_v44 = vld [vmem:[#allocation11 + $0x20] sm:$0xff]   ;;  %v2606_v45 = vld [vmem:[#allocation11 + $0x28] sm:$0xff]  }
 0x679   : > { %v1471_v59 = vmul.f32 0.1, %v1427_v53  ;;  %v1430_v60 = vadd.f32 %v2353_v58, %v3334_v27  ;;  %v1421_v61 = vpop.f32.mrb[39].mxu1  ;;  %v2015_v58 = vld [vmem:[%s3431_s5 + $0x3] ss:$0 sm:$0xff] }
 0x67a   : > { %v1469_v62 = vmul.f32 0.1, %v1419_v57  ;;  %v1422_v63 = vadd.f32 %v3334_v27, %v1421_v61  ;;  %2439 = vmatpush3.bf16.msra.mxu0 %v2438_v55  ;;  %v2607_v55 = vld [vmem:[#allocation11 + $0x30] sm:$0xff]  }
 0x67b   : > { %v1472_v0 = vmul.f32 0.1, %v1430_v60  ;;  %2440 = vmatprep.subr.bf16.mxu0 %v2871_v25  ;;  %v1487_v2 = vmax.f32 %v1427_v53, %v1471_v59 }
 0x67c   : > { %v1470_v1 = vmul.f32 0.1, %v1422_v63  ;;  %v1485_v4 = vmax.f32 %v1419_v57, %v1469_v62  ;;  %v2608_v57 = vld [vmem:[#allocation11 + $0x38] sm:$0xff]  }
 0x67d   : > { %v1488_v3 = vmax.f32 %v1430_v60, %v1472_v0 }
 0x67e   : > { %v1486_v5 = vmax.f32 %v1422_v63, %v1470_v1  ;;  %v2356_v6 = vpop.f32.mrb[40].mxu1  ;;  %2442 = vmatpush3.bf16.msra.mxu0 %v2441_v16 }
 0x67f   : > { %v2447_v7 = vpack.c.bf16 %v1488_v3, %v1487_v2  ;;  %v1443_v42 = vadd.f32 %v2356_v6, %v3334_v27  ;;  %v1434_v8 = vpop.f32.mrb[41].mxu1  ;;  %2443 = vmatprep.subr.bf16.mxu0 %v2871_v25 }
 0x680   : > { %v2444_v9 = vpack.c.bf16 %v1486_v5, %v1485_v4  ;;  %v1435_v10 = vadd.f32 %v3334_v27, %v1434_v8  ;;  %v2357_v11 = vpop.f32.mrb[42].mxu1 }
 0x681   : > { %v1475_v12 = vmul.f32 0.1, %v1443_v42  ;;  %v1446_v56 = vadd.f32 %v2357_v11, %v3334_v27  ;;  %v1437_v13 = vpop.f32.mrb[43].mxu1 }
 0x682   : > { %v1473_v14 = vmul.f32 0.1, %v1435_v10  ;;  %v1438_v15 = vadd.f32 %v3334_v27, %v1437_v13  ;;  %2445 = vmatpush3.bf16.msra.mxu0 %v2444_v9 }
 0x683   : > { %v1476_v17 = vmul.f32 0.1, %v1446_v56  ;;  %2446 = vmatprep.subr.bf16.mxu0 %v2871_v25  ;;  %v1491_v19 = vmax.f32 %v1443_v42, %v1475_v12 }
 0x684   : > { %v1474_v18 = vmul.f32 0.1, %v1438_v15  ;;  %v1489_v21 = vmax.f32 %v1435_v10, %v1473_v14 }
 0x685   : > { %v1492_v20 = vmax.f32 %v1446_v56, %v1476_v17 }
 0x686   : > { %v1490_v22 = vmax.f32 %v1438_v15, %v1474_v18  ;;  %v2360_v23 = vpop.f32.mrb[44].mxu1  ;;  %2448 = vmatpush3.bf16.msra.mxu0 %v2447_v7 }
 0x687   : > { %v2453_v24 = vpack.c.bf16 %v1492_v20, %v1491_v19  ;;  %v1459_v46 = vadd.f32 %v2360_v23, %v3334_v27  ;;  %v1450_v47 = vpop.f32.mrb[45].mxu1  ;;  %2449 = vmatprep.subr.bf16.mxu0 %v2871_v25 }
 0x688   : > { %v2450_v48 = vpack.c.bf16 %v1490_v22, %v1489_v21  ;;  %v1451_v49 = vadd.f32 %v3334_v27, %v1450_v47  ;;  %v2361_v50 = vpop.f32.mrb[46].mxu1 }
 0x689   : > { %v1479_v51 = vmul.f32 0.1, %v1459_v46  ;;  %v1462_v52 = vadd.f32 %v2361_v50, %v3334_v27  ;;  %v1453_v28 = vpop.f32.mrb[47].mxu1 }
 0x68a   : > { %v1477_v29 = vmul.f32 0.1, %v1451_v49  ;;  %v1454_v30 = vadd.f32 %v3334_v27, %v1453_v28  ;;  %2451 = vmatpush3.bf16.msra.mxu0 %v2450_v48  ;;  %v1497_v27 = vld [vmem:[%s3204_s22] sm:$0xff]  ;;  %s2783_s22 = scalar_lea.vmem %s3384_s18, 128 }
 0x68b   : > { %v1480_v31 = vmul.f32 0.1, %v1462_v52  ;;  %2452 = vmatprep.subr.bf16.mxu0 %v2871_v25  ;;  %v1495_v33 = vmax.f32 %v1459_v46, %v1479_v51  ;;  %p2784_p10 = scmp.ne.s32.totalorder %s3384_s18, %s2783_s22  ;;  %p2791_p7 = scmp.lt.s32.totalorder %s2789_s11, %s2783_s22 }
 0x68c   : > { %v1478_v32 = vmul.f32 0.1, %v1454_v30  ;;  %v1493_v35 = vmax.f32 %v1451_v49, %v1477_v29 }
 0x68d   : > { %v1496_v34 = vmax.f32 %v1462_v52, %v1480_v31  ;;  %p2785_p4 = pnand %p2784_p10, %p3497_p0  ;;  %p2792_p3 = por %p2791_p7, %p2790_p13 }
 0x68e   : > { %v1494_v36 = vmax.f32 %v1454_v30, %v1478_v32  ;;  %2454 = vmatpush3.bf16.msra.mxu0 %v2453_v24 }
 0x68f   : > { %v2459_v37 = vpack.c.bf16 %v1496_v34, %v1495_v33  ;;  %2455 = vmatprep.subr.bf16.mxu0 %v2871_v25  ;;  %p2786_p11 = pneg %p2785_p4 }
 0x690   : > { %v2456_v38 = vpack.c.bf16 %v1494_v36, %v1493_v35 }
 0x691   : > { %p2793_p5 = pnand %p2792_p3, %p2786_p11 }
 0x692   : > { %2457 = vmatpush3.bf16.msra.mxu0 %v2456_v38 }
 0x693   : > { %2458 = vmatprep.subr.bf16.mxu0 %v2871_v25  ;;  %v2604_v25 = vld [vmem:[#allocation11 + $0x18] sm:$0xff]  }
 0x696   : > { %2460 = vmatpush3.bf16.msra.mxu0 %v2459_v37 }
 0x697   : > { %2417 = vmatprep.subr.bf16.mxu0 %v2873_v26 }
 0x699   : > { %2395 = vmatmul.mubr.f32.vlgmr.msra.gmra.mrb[48].mxu0 %v1497_v27 }
 0x69a   : > { %2433 = vmatprep.mubr.msk.bf16.mxu0 %vm2872_vm0, %v2873_v26  ;;  %2418 = vmatpush3.bf16.msra.mxu0 %v2601_v40 }
 0x69b   : > { %2419 = vmatprep.subr.bf16.mxu0 %v2873_v26 }
 0x69e   : > { %2420 = vmatpush3.bf16.msra.mxu0 %v2602_v41 }
 0x69f   : > { %2421 = vmatprep.subr.bf16.mxu0 %v2873_v26 }
 0x6a2   : > { %2422 = vmatpush3.bf16.msra.mxu0 %v2603_v43 }
 0x6a3   : > { %2423 = vmatprep.subr.bf16.mxu0 %v2873_v26 }
 0x6a6   : > { %2424 = vmatpush3.bf16.msra.mxu0 %v2604_v25 }
 0x6a7   : > { %2425 = vmatprep.subr.bf16.mxu0 %v2873_v26 }
 0x6aa   : > { %2426 = vmatpush3.bf16.msra.mxu0 %v2605_v44 }
 0x6ab   : > { %2427 = vmatprep.subr.bf16.mxu0 %v2873_v26 }
 0x6ae   : > { %2428 = vmatpush3.bf16.msra.mxu0 %v2606_v45 }
 0x6af   : > { %2429 = vmatprep.subr.bf16.mxu0 %v2873_v26 }
 0x6b2   : > { %2430 = vmatpush3.bf16.msra.mxu0 %v2607_v55 }
 0x6b3   : > { %2431 = vmatprep.subr.bf16.mxu0 %v2873_v26  ;;  %v2024_v26 = vld [vmem:[%s3494_s10] ss:$0 sm:$0xff] }
 0x6b6   : > { %2432 = vmatpush3.bf16.msra.mxu0 %v2608_v57 }
 0x76c   : > { %v1564_v16 = vpop.f32.mrb[48].mxu0 }
 0x76d   : > { %v1568_v53 = vpack.c.bf16 %v1564_v16, %v1564_v16  ;;  %v2396_v54 = vpop.f32.mrb[49].mxu0 }
 0x76f   : > { %2414 = vmatmul.mubr.bf16.vlgmr.msra.gmra.mrb[48].mxu1 %v1568_v53 }
 0x842   : > { %v1673_v59 = vpop.f32.mrb[48].mxu1 }
 0x843   : > { %v1674_v60 = vadd.f32 %v2015_v58, %v1673_v59  ;;  %v2415_v61 = vpop.f32.mrb[49].mxu1 }
 0x844   : > { %v1676_v62 = vpop.f32.mrb[50].mxu1 }
 0x845   : > { %v1679_v63 = vmul.f32 0.1, %v1674_v60  ;;  %v2416_v0 = vpop.f32.mrb[51].mxu1 }
 0x847   : > { %v1680_v1 = vmax.f32 %v1674_v60, %v1679_v63 }
 0x849   : > { %v1681_v2 = vpack.c.bf16 %v1680_v1, %v1680_v1 }
 0x84b   : > { %2434 = vmatmul.mubr.bf16.vlgmr.msra.gmra.mrb[52].mxu0 %v1681_v2 }
 0x91e   : > { %v1787_v3 = vpop.f32.mrb[52].mxu0 }
 0x91f   : > { %v1788_v4 = vadd.f32 %v2024_v26, %v1787_v3  ;;  %v2435_v5 = vpop.f32.mrb[53].mxu0 }
 0x920   : > { %v1790_v6 = vpop.f32.mrb[54].mxu0 }
 0x921   : > { %1793 = vst [vmem:[%s441_s21] sm:$0xff] %v1788_v4  ;;  %v2436_v7 = vpop.f32.mrb[55].mxu0 }
 0x922   : > { %2796 = shalt.err (!%p2793_p5)
}
 0x923   : > { %s2797_s29 = scalar_lea.hbm %s3382_s15, 128  ;;  %s2801_s1 = scalar_lea.hbm %s3496_s13, 256 }
 0x924   : > { %p2798_p8 = scmp.ne.s32.totalorder %s3382_s15, %s2797_s29  ;;  %p2802_p12 = scmp.lt.u32.totalorder %s3382_s15, %s3496_s13 }
 0x925   : > { %p2803_p1 = scmp.lt.u32.totalorder %s2801_s1, %s2797_s29  ;;  %p2805_p10 = scmp.lt.u32.totalorder %s2797_s29, %s3382_s15 }
 0x926   : > { %p2799_p2 = pnand %p2798_p8, %p3497_p0 }
 0x927   : > { %p2804_p6 = por %p2803_p1, %p2802_p12 }
 0x928   : > { %p2800_p9 = pneg %p2799_p2 }
 0x929   : > { %p2806_p4 = por %p2805_p10, %p2804_p6 }
 0x92b   : > { %p2807_p11 = pnand %p2806_p4, %p2800_p9 }
 0x92d   : > { %2810 = shalt.err (!%p2807_p11)
}
 0x92e   : > { %2479 = dma.vmem_to_hbm [thread:$0]  (%p3497_p0), %s3384_s18, 128, %s3382_s15, %s1795_s9  }
 0x92f PF: > { %s3498_s8 = sld [smem:[#allocation19_spill]]  ;;  %s3499_s25 = sld [smem:[#allocation21_spill]] }
 0x930   : > { %p3501_p7 = scmp.ge.s32.totalorder %s2861_s30, 2 }
 0x935   : > { %s1820_s26 = sand.u32 1, %s3498_s8   ;;  %p3500_p13 = scmp.ne.s32.totalorder %s3499_s25, 0 }
 0x936   : > { %s1821_s14 = scalar_lea.sflag [#allocation4], %s1820_s26 }
 0x937   : > { %p2502_p3 = pnand %p3501_p7, %p3500_p13 }
 0x939   : > { %2844 = dma.done.wait (!%p2502_p3), %s1821_s14, 128  }
 0x93a   : > { %2846 = vsyncadd (!%p2502_p3), %s1821_s14, 4294967168  ;;  %s3502_s30 = sld [smem:[#allocation22_spill]]  ;;  %s3503_s10 = sld [smem:[#allocation20_spill]] }
 0x93b   : > { %s3504_s29 = sld [smem:[#allocation23_spill]]  ;;  %s3505_s27 = smov %s2853_s28 }
 0x940   : > { %p26_p5 = scmp.ge.s32.totalorder %s3502_s30, 4   ;;  %s3506_s28 = smov %s3503_s10 }
 0x942   :  { %28 = sbr.rel (!%p26_p5) target bundleno = 14 (0xe), region = 135 }
 0x949   :  { %1826 = vsyncpa [#allocation3], 1 }
 0x94a   :  { %1828 = vsyncpa [#allocation3 + $0x1], 1 }
 0x94b   :  { %1829 = vsyncpa [#allocation6], 1 }
 0x94c   :  { %1831 = vsyncpa [#allocation6 + $0x1], 1 }
 0x94d   :  { %1832 = vsyncpa [#allocation9], 1 }
 0x94e   :  { %1833 = vsyncpa [#allocation12], 1 }
 0x94f   :  { %1834 = vsyncpa [#allocation4], 1 }
 0x950   :  { %1836 = vsyncpa [#allocation4 + $0x1], 1 }

</bundles_post_ra>
